<compile_context>
chip_gen: v7x
topology: tpu7x:2x2x1
jax: 0.10.0
libtpu: 0.0.40
codegen_flags: <defaults>
</compile_context>

<pallas_src>
import functools

import jax
import jax.numpy as jnp
from jax.experimental import pallas as pl
from jax.experimental.pallas import tpu as pltpu


def _softplus(x):
    # Matches torch.nn.Softplus(beta=1, threshold=20).
    return jnp.where(x > 20.0, x, jnp.log1p(jnp.exp(jnp.minimum(x, 20.0))))


def _round_up(x, m):
    return ((x + m - 1) // m) * m


def _mirt_kernel(degree, edge_dim, edge_attr_ref, row_ref, col_ref, mean_ref,
                 stu_t_ref, item_sp_t_ref, offset_ref, w_ref, pred_ref):
    # Lane-dense, transposed layout: edges live on the minor (lane) axis.
    #   edge_attr_ref: [edge_dim, TE]   row_ref/col_ref: [1, TE] int32
    #   mean_ref:      [edge_dim, 1]    (resident)
    #   stu_t_ref:     [ndims, n_stu_p] (resident, student_emb.T)
    #   item_sp_t_ref: [ndims, n_item_p](resident, softplus(item_emb).T)
    #   offset_ref:    [n_item_p, 1]    (resident)
    #   w_ref:         [ndims, edge_dim*degree] (resident)
    #   pred_ref:      [1, TE]
    te = edge_attr_ref.shape[1]
    n_stu_p = stu_t_ref.shape[1]
    n_item_p = item_sp_t_ref.shape[1]

    # ---- In-kernel embedding gathers: one-hot(idx) @ table on the idle MXU.
    # The f32 tables are split into bf16 hi+lo parts so the native bf16 MXU
    # path reproduces the exact f32 gather (one-hot entries are exact in bf16).
    def gather(table_ref, oh_bf16):
        tbl = table_ref[...]
        hi = tbl.astype(jnp.bfloat16)
        lo = (tbl - hi.astype(jnp.float32)).astype(jnp.bfloat16)
        return (jnp.dot(hi, oh_bf16, preferred_element_type=jnp.float32)
                + jnp.dot(lo, oh_bf16, preferred_element_type=jnp.float32))

    row = row_ref[...]                                         # [1, TE] int32
    col = col_ref[...]                                         # [1, TE] int32

    stu_iota = jax.lax.broadcasted_iota(jnp.int32, (n_stu_p, te), 0)
    row_oh = (stu_iota == row).astype(jnp.float32).astype(jnp.bfloat16)
    z_student = gather(stu_t_ref, row_oh)                      # [ndims, TE]

    item_iota = jax.lax.broadcasted_iota(jnp.int32, (n_item_p, te), 0)
    col_hit = item_iota == col                                 # [n_item_p, TE]
    col_oh = col_hit.astype(jnp.float32).astype(jnp.bfloat16)
    sp_item = gather(item_sp_t_ref, col_oh)                    # [ndims, TE]
    # Offset gather: tiny, exact, sublane select + reduce on the VPU/XLU.
    z_offset = jnp.sum(jnp.where(col_hit, offset_ref[...], 0.0),
                       axis=0, keepdims=True)                  # [1, TE]

    # ---- Centered polynomial features + W contraction as a broadcast-FMA
    # chain on the VPU (feat_dim is tiny; running product, no concatenation).
    # TODO(synk): on v7x, if the bundle shows VALU-bound after the byte cuts,
    # move this contraction onto the idle MXU as jnp.dot(w, poly_feat).
    ef0 = edge_attr_ref[...] - mean_ref[...]                   # [edge_dim, TE]
    w = w_ref[...]                                             # [ndims, feat_dim]
    z_ability = z_student
    f = ef0
    for p in range(degree):
        if p > 0:
            f = f * ef0                                        # ef0 ** (p + 1)
        for k in range(edge_dim):
            c = p * edge_dim + k
            z_ability = z_ability + w[:, c:c + 1] * f[k:k + 1, :]

    # softplus(item) was precomputed per item in the wrapper: just multiply,
    # reduce over ndims (sublane axis) and add the offset -> [1, TE] store.
    pred_ref[...] = jnp.sum(sp_item * z_ability, axis=0, keepdims=True) + z_offset


def mirt_2pl_forward(edge_attr, row, col, student_emb, item_emb, offset_emb, w,
                     *, degree=1, tile_e=1024):
    """MIRT_2PL forward (student_lin / item_lin = None path).

    edge_attr: [E, edge_dim]    row/col: [E] int    student_emb: [n_stu, ndims]
    item_emb: [n_item, ndims]   offset_emb: [n_item, 1]
    w: [ndims, edge_dim*degree]                      ->  pred [E, 1]
    """
    E, edge_dim = edge_attr.shape
    n_stu, ndims = student_emb.shape
    n_item = item_emb.shape[0]
    feat_dim = edge_dim * degree
    assert w.shape == (ndims, feat_dim)
    assert offset_emb.shape == (n_item, 1)
    assert tile_e % 128 == 0, "keep edge tiles lane-dense (multiple of 128)"

    # Column mean over the real edges (no padded rows exist); the centering
    # itself stays inside the kernel (free VPU filler).
    mean_t = jnp.mean(edge_attr.astype(jnp.float32), axis=0)[:, None]  # [edge_dim,1]

    # The ONLY per-edge relayout left: edge_attr -> lane-dense [edge_dim, E].
    # (Kept in f32 to preserve the module's numerics; bf16 streaming would
    #  halve these 16 B/edge at the cost of looser precision.)
    edge_attr_t = edge_attr.astype(jnp.float32).T                      # [edge_dim, E]
    row_v = jnp.asarray(row, jnp.int32).reshape(1, E)
    col_v = jnp.asarray(col, jnp.int32).reshape(1, E)

    # Tiny VMEM-resident tables, transposed to [ndims, n_entities]; softplus is
    # folded into the item table (per item, not per edge).  The entity axis is
    # zero-padded to a multiple of 8 for sublane alignment of the one-hot
    # contraction; padded columns are never selected by valid indices.
    n_stu_p = _round_up(n_stu, 8)
    n_item_p = _round_up(n_item, 8)
    stu_t = jnp.zeros((ndims, n_stu_p), jnp.float32).at[:, :n_stu].set(
        student_emb.astype(jnp.float32).T)
    item_sp_t = jnp.zeros((ndims, n_item_p), jnp.float32).at[:, :n_item].set(
        _softplus(item_emb.astype(jnp.float32)).T)
    offset_c = jnp.zeros((n_item_p, 1), jnp.float32).at[:n_item].set(
        offset_emb.astype(jnp.float32))
    w = w.astype(jnp.float32)

    # Edge tiling: cap the tile at the 128-rounded edge count; grid via cdiv,
    # a partial final tile is handled by Pallas OOB masking (no tile_e-multiple
    # padding pass).  tile_e is sweepable; keep >= 2 grid steps on v7x so the
    # "parallel" axis shards over both TensorCores.  VMEM use at tile_e=1024 is
    # ~1 MB, far under the 32 MiB scoped default on every generation.
    tile_e = min(tile_e, _round_up(E, 128))
    grid = (pl.cdiv(E, tile_e),)

    kernel = functools.partial(_mirt_kernel, degree, edge_dim)

    pred_t = pl.pallas_call(
        kernel,
        out_shape=jax.ShapeDtypeStruct((1, E), jnp.float32),
        grid_spec=pltpu.PrefetchScalarGridSpec(
            num_scalar_prefetch=0,
            grid=grid,
            in_specs=[
                pl.BlockSpec((edge_dim, tile_e), lambda i: (0, i)),   # streamed
                pl.BlockSpec((1, tile_e), lambda i: (0, i)),          # streamed
                pl.BlockSpec((1, tile_e), lambda i: (0, i)),          # streamed
                pl.BlockSpec((edge_dim, 1), lambda i: (0, 0)),        # resident
                pl.BlockSpec((ndims, n_stu_p), lambda i: (0, 0)),     # resident
                pl.BlockSpec((ndims, n_item_p), lambda i: (0, 0)),    # resident
                pl.BlockSpec((n_item_p, 1), lambda i: (0, 0)),        # resident
                pl.BlockSpec((ndims, feat_dim), lambda i: (0, 0)),    # resident
            ],
            out_specs=pl.BlockSpec((1, tile_e), lambda i: (0, i)),
        ),
        compiler_params=pltpu.CompilerParams(
            dimension_semantics=("parallel",)),
    )(edge_attr_t, row_v, col_v, mean_t, stu_t, item_sp_t, offset_c, w)

    return pred_t.reshape(E, 1)


def reference_forward(edge_attr, row, col, student_emb, item_emb, offset_emb,
                      w, *, degree=1):
    z_student = student_emb[row]
    z_item = item_emb[col]
    z_offset = offset_emb[col]
    ef0 = edge_attr - jnp.mean(edge_attr, axis=0, keepdims=True)
    feats = [ef0] + [ef0 ** p for p in range(2, degree + 1)]
    edge_feat = jnp.concatenate(feats, axis=-1)
    z_ability = z_student + jnp.matmul(edge_feat, w.T,
                                       precision=jax.lax.Precision.HIGHEST)
    z_edge = _softplus(z_item) * z_ability
    return jnp.sum(z_edge, axis=-1, keepdim=True) if False else \
        jnp.sum(z_edge, axis=-1, keepdims=True) + z_offset


if __name__ == "__main__":
    # Small synthetic graph: 8 students, 6 items, 4096 responses (edges).
    # tile_e=1024 -> 4 grid steps, so v7x can use both TensorCores.
    n_students, n_items = 8, 6
    ndims, edge_dim, degree = 16, 4, 2
    E = 4096
    tile_e = 1024

    key = jax.random.PRNGKey(0)
    k_semb, k_iemb, k_oemb, k_w, k_row, k_col, k_attr = jax.random.split(key, 7)

    # Deterministic parameter init (mirrors the module's __init__ shapes).
    student_emb = jax.random.normal(k_semb, (n_students, ndims), jnp.float32)  # N(0,1)
    item_emb = jax.random.normal(k_iemb, (n_items, ndims), jnp.float32)        # N(0,1)
    offset_emb = jax.random.normal(k_oemb, (n_items, 1), jnp.float32)
    w = jax.random.normal(k_w, (ndims, edge_dim * degree), jnp.float32) * 0.1  # Linear weight

    # Graph data (node_id == arange, so emb(node_id)[row] == emb_table[row]).
    row = jax.random.randint(k_row, (E,), 0, n_students)
    col = jax.random.randint(k_col, (E,), 0, n_items)
    edge_attr = jax.random.normal(k_attr, (E, edge_dim), jnp.float32)

    pred = mirt_2pl_forward(edge_attr, row, col, student_emb, item_emb,
                            offset_emb, w, degree=degree, tile_e=tile_e)
    pred = jax.block_until_ready(pred)

    ref = reference_forward(edge_attr, row, col, student_emb, item_emb,
                            offset_emb, w, degree=degree)
    assert pred.shape == (E, 1)
    max_err = float(jnp.max(jnp.abs(pred - ref)))
    assert jnp.allclose(pred, ref, atol=1e-3, rtol=1e-3), f"max abs err {max_err}"

    print("KERNEL_OK")
</pallas_src>

<mosaic_0001>
module attributes {stable_mosaic.version = 11 : i64} {
  func.func @_mirt_kernel(%arg0: i32, %arg1: memref<4x1024xf32, #tpu.memory_space<vmem>>, %arg2: memref<1x1024xi32, #tpu.memory_space<vmem>>, %arg3: memref<1x1024xi32, #tpu.memory_space<vmem>>, %arg4: memref<4x1xf32, #tpu.memory_space<vmem>>, %arg5: memref<16x8xf32, #tpu.memory_space<vmem>>, %arg6: memref<16x8xf32, #tpu.memory_space<vmem>>, %arg7: memref<8x1xf32, #tpu.memory_space<vmem>>, %arg8: memref<16x8xf32, #tpu.memory_space<vmem>>, %arg9: memref<1x1024xf32, #tpu.memory_space<vmem>>) attributes {dimension_semantics = [#tpu.dimension_semantics<parallel>], iteration_bounds = array<i64: 4>, scalar_prefetch = 0 : i64, scratch_operands = 0 : i64, tpu.core_type = #tpu.core_type<tc>, window_params = [{transform_indices = @transform_0, window_bounds = array<i64: 4, 1024>}, {transform_indices = @transform_1, window_bounds = array<i64: 1, 1024>}, {transform_indices = @transform_2, window_bounds = array<i64: 1, 1024>}, {pipeline_mode = #tpu.pipeline_mode<synchronous>, transform_indices = @transform_3, window_bounds = array<i64: 4, 1>}, {pipeline_mode = #tpu.pipeline_mode<synchronous>, transform_indices = @transform_4, window_bounds = array<i64: 16, 8>}, {pipeline_mode = #tpu.pipeline_mode<synchronous>, transform_indices = @transform_5, window_bounds = array<i64: 16, 8>}, {pipeline_mode = #tpu.pipeline_mode<synchronous>, transform_indices = @transform_6, window_bounds = array<i64: 8, 1>}, {pipeline_mode = #tpu.pipeline_mode<synchronous>, transform_indices = @transform_7, window_bounds = array<i64: 16, 8>}, {transform_indices = @transform_8, window_bounds = array<i64: 1, 1024>}]} {
    %c0 = arith.constant 0 : index
    %c0_0 = arith.constant 0 : index
    %0 = vector.load %arg2[%c0, %c0_0] : memref<1x1024xi32, #tpu.memory_space<vmem>>, vector<1x1024xi32>
    %c0_1 = arith.constant 0 : index
    %c0_2 = arith.constant 0 : index
    %1 = vector.load %arg3[%c0_1, %c0_2] : memref<1x1024xi32, #tpu.memory_space<vmem>>, vector<1x1024xi32>
    %2 = tpu.iota {dimensions = array<i32: 0>} : vector<8x1024xi32>
    %3 = vector.broadcast %0 : vector<1x1024xi32> to vector<8x1024xi32>
    %4 = arith.cmpi eq, %2, %3 : vector<8x1024xi32>
    %5 = arith.extui %4 : vector<8x1024xi1> to vector<8x1024xi32>
    %6 = arith.sitofp %5 : vector<8x1024xi32> to vector<8x1024xf32>
    %7 = arith.truncf %6 : vector<8x1024xf32> to vector<8x1024xbf16>
    %c0_3 = arith.constant 0 : index
    %c0_4 = arith.constant 0 : index
    %8 = vector.load %arg5[%c0_3, %c0_4] : memref<16x8xf32, #tpu.memory_space<vmem>>, vector<16x8xf32>
    %9 = arith.truncf %8 : vector<16x8xf32> to vector<16x8xbf16>
    %10 = arith.extf %9 : vector<16x8xbf16> to vector<16x8xf32>
    %11 = arith.subf %8, %10 : vector<16x8xf32>
    %12 = arith.truncf %11 : vector<16x8xf32> to vector<16x8xbf16>
    %cst = arith.constant dense<0.000000e+00> : vector<16x1024xf32>
    %13 = tpu.matmul %9, %7, %cst {dimension_numbers = #tpu.dot_dimension_numbers<[1], [0], [0], [1], [0, 0, 1, 1], [], []>} : vector<16x8xbf16>, vector<8x1024xbf16>, vector<16x1024xf32> -> vector<16x1024xf32>
    %cst_5 = arith.constant dense<0.000000e+00> : vector<16x1024xf32>
    %14 = tpu.matmul %12, %7, %cst_5 {dimension_numbers = #tpu.dot_dimension_numbers<[1], [0], [0], [1], [0, 0, 1, 1], [], []>} : vector<16x8xbf16>, vector<8x1024xbf16>, vector<16x1024xf32> -> vector<16x1024xf32>
    %15 = arith.addf %13, %14 : vector<16x1024xf32>
    %16 = tpu.iota {dimensions = array<i32: 0>} : vector<8x1024xi32>
    %17 = vector.broadcast %1 : vector<1x1024xi32> to vector<8x1024xi32>
    %18 = arith.cmpi eq, %16, %17 : vector<8x1024xi32>
    %19 = arith.extui %18 : vector<8x1024xi1> to vector<8x1024xi32>
    %20 = arith.sitofp %19 : vector<8x1024xi32> to vector<8x1024xf32>
    %21 = arith.truncf %20 : vector<8x1024xf32> to vector<8x1024xbf16>
    %c0_6 = arith.constant 0 : index
    %c0_7 = arith.constant 0 : index
    %22 = vector.load %arg6[%c0_6, %c0_7] : memref<16x8xf32, #tpu.memory_space<vmem>>, vector<16x8xf32>
    %23 = arith.truncf %22 : vector<16x8xf32> to vector<16x8xbf16>
    %24 = arith.extf %23 : vector<16x8xbf16> to vector<16x8xf32>
    %25 = arith.subf %22, %24 : vector<16x8xf32>
    %26 = arith.truncf %25 : vector<16x8xf32> to vector<16x8xbf16>
    %cst_8 = arith.constant dense<0.000000e+00> : vector<16x1024xf32>
    %27 = tpu.matmul %23, %21, %cst_8 {dimension_numbers = #tpu.dot_dimension_numbers<[1], [0], [0], [1], [0, 0, 1, 1], [], []>} : vector<16x8xbf16>, vector<8x1024xbf16>, vector<16x1024xf32> -> vector<16x1024xf32>
    %cst_9 = arith.constant dense<0.000000e+00> : vector<16x1024xf32>
    %28 = tpu.matmul %26, %21, %cst_9 {dimension_numbers = #tpu.dot_dimension_numbers<[1], [0], [0], [1], [0, 0, 1, 1], [], []>} : vector<16x8xbf16>, vector<8x1024xbf16>, vector<16x1024xf32> -> vector<16x1024xf32>
    %29 = arith.addf %27, %28 : vector<16x1024xf32>
    %c0_10 = arith.constant 0 : index
    %c0_11 = arith.constant 0 : index
    %30 = vector.load %arg7[%c0_10, %c0_11] : memref<8x1xf32, #tpu.memory_space<vmem>>, vector<8x1xf32>
    %cst_12 = arith.constant 0.000000e+00 : f32
    %31 = vector.shape_cast %30 : vector<8x1xf32> to vector<8x1xf32>
    %32 = vector.broadcast %31 : vector<8x1xf32> to vector<8x1024xf32>
    %33 = vector.broadcast %cst_12 : f32 to vector<8x1024xf32>
    %34 = arith.select %18, %32, %33 : vector<8x1024xi1>, vector<8x1024xf32>
    %cst_13 = arith.constant dense<0.000000e+00> : vector<1024xf32>
    %35 = vector.multi_reduction <add>, %34, %cst_13 [0] : vector<8x1024xf32> to vector<1024xf32>
    %36 = vector.shape_cast %35 : vector<1024xf32> to vector<1x1024xf32>
    %c0_14 = arith.constant 0 : index
    %c0_15 = arith.constant 0 : index
    %37 = vector.load %arg1[%c0_14, %c0_15] : memref<4x1024xf32, #tpu.memory_space<vmem>>, vector<4x1024xf32>
    %c0_16 = arith.constant 0 : index
    %c0_17 = arith.constant 0 : index
    %38 = vector.load %arg4[%c0_16, %c0_17] : memref<4x1xf32, #tpu.memory_space<vmem>>, vector<4x1xf32>
    %39 = vector.broadcast %38 : vector<4x1xf32> to vector<4x1024xf32>
    %40 = arith.subf %37, %39 : vector<4x1024xf32>
    %c0_18 = arith.constant 0 : index
    %c0_19 = arith.constant 0 : index
    %41 = vector.load %arg8[%c0_18, %c0_19] : memref<16x8xf32, #tpu.memory_space<vmem>>, vector<16x8xf32>
    %42 = vector.extract_strided_slice %41 {offsets = [0, 0], sizes = [16, 1], strides = [1, 1]} : vector<16x8xf32> to vector<16x1xf32>
    %43 = vector.extract_strided_slice %40 {offsets = [0, 0], sizes = [1, 1024], strides = [1, 1]} : vector<4x1024xf32> to vector<1x1024xf32>
    %44 = vector.broadcast %42 : vector<16x1xf32> to vector<16x1024xf32>
    %45 = vector.broadcast %43 : vector<1x1024xf32> to vector<16x1024xf32>
    %46 = arith.mulf %44, %45 : vector<16x1024xf32>
    %47 = arith.addf %15, %46 : vector<16x1024xf32>
    %48 = vector.extract_strided_slice %41 {offsets = [0, 1], sizes = [16, 1], strides = [1, 1]} : vector<16x8xf32> to vector<16x1xf32>
    %49 = vector.extract_strided_slice %40 {offsets = [1, 0], sizes = [1, 1024], strides = [1, 1]} : vector<4x1024xf32> to vector<1x1024xf32>
    %50 = vector.broadcast %48 : vector<16x1xf32> to vector<16x1024xf32>
    %51 = vector.broadcast %49 : vector<1x1024xf32> to vector<16x1024xf32>
    %52 = arith.mulf %50, %51 : vector<16x1024xf32>
    %53 = arith.addf %47, %52 : vector<16x1024xf32>
    %54 = vector.extract_strided_slice %41 {offsets = [0, 2], sizes = [16, 1], strides = [1, 1]} : vector<16x8xf32> to vector<16x1xf32>
    %55 = vector.extract_strided_slice %40 {offsets = [2, 0], sizes = [1, 1024], strides = [1, 1]} : vector<4x1024xf32> to vector<1x1024xf32>
    %56 = vector.broadcast %54 : vector<16x1xf32> to vector<16x1024xf32>
    %57 = vector.broadcast %55 : vector<1x1024xf32> to vector<16x1024xf32>
    %58 = arith.mulf %56, %57 : vector<16x1024xf32>
    %59 = arith.addf %53, %58 : vector<16x1024xf32>
    %60 = vector.extract_strided_slice %41 {offsets = [0, 3], sizes = [16, 1], strides = [1, 1]} : vector<16x8xf32> to vector<16x1xf32>
    %61 = vector.extract_strided_slice %40 {offsets = [3, 0], sizes = [1, 1024], strides = [1, 1]} : vector<4x1024xf32> to vector<1x1024xf32>
    %62 = vector.broadcast %60 : vector<16x1xf32> to vector<16x1024xf32>
    %63 = vector.broadcast %61 : vector<1x1024xf32> to vector<16x1024xf32>
    %64 = arith.mulf %62, %63 : vector<16x1024xf32>
    %65 = arith.addf %59, %64 : vector<16x1024xf32>
    %66 = arith.mulf %40, %40 : vector<4x1024xf32>
    %67 = vector.extract_strided_slice %41 {offsets = [0, 4], sizes = [16, 1], strides = [1, 1]} : vector<16x8xf32> to vector<16x1xf32>
    %68 = vector.extract_strided_slice %66 {offsets = [0, 0], sizes = [1, 1024], strides = [1, 1]} : vector<4x1024xf32> to vector<1x1024xf32>
    %69 = vector.broadcast %67 : vector<16x1xf32> to vector<16x1024xf32>
    %70 = vector.broadcast %68 : vector<1x1024xf32> to vector<16x1024xf32>
    %71 = arith.mulf %69, %70 : vector<16x1024xf32>
    %72 = arith.addf %65, %71 : vector<16x1024xf32>
    %73 = vector.extract_strided_slice %41 {offsets = [0, 5], sizes = [16, 1], strides = [1, 1]} : vector<16x8xf32> to vector<16x1xf32>
    %74 = vector.extract_strided_slice %66 {offsets = [1, 0], sizes = [1, 1024], strides = [1, 1]} : vector<4x1024xf32> to vector<1x1024xf32>
    %75 = vector.broadcast %73 : vector<16x1xf32> to vector<16x1024xf32>
    %76 = vector.broadcast %74 : vector<1x1024xf32> to vector<16x1024xf32>
    %77 = arith.mulf %75, %76 : vector<16x1024xf32>
    %78 = arith.addf %72, %77 : vector<16x1024xf32>
    %79 = vector.extract_strided_slice %41 {offsets = [0, 6], sizes = [16, 1], strides = [1, 1]} : vector<16x8xf32> to vector<16x1xf32>
    %80 = vector.extract_strided_slice %66 {offsets = [2, 0], sizes = [1, 1024], strides = [1, 1]} : vector<4x1024xf32> to vector<1x1024xf32>
    %81 = vector.broadcast %79 : vector<16x1xf32> to vector<16x1024xf32>
    %82 = vector.broadcast %80 : vector<1x1024xf32> to vector<16x1024xf32>
    %83 = arith.mulf %81, %82 : vector<16x1024xf32>
    %84 = arith.addf %78, %83 : vector<16x1024xf32>
    %85 = vector.extract_strided_slice %41 {offsets = [0, 7], sizes = [16, 1], strides = [1, 1]} : vector<16x8xf32> to vector<16x1xf32>
    %86 = vector.extract_strided_slice %66 {offsets = [3, 0], sizes = [1, 1024], strides = [1, 1]} : vector<4x1024xf32> to vector<1x1024xf32>
    %87 = vector.broadcast %85 : vector<16x1xf32> to vector<16x1024xf32>
    %88 = vector.broadcast %86 : vector<1x1024xf32> to vector<16x1024xf32>
    %89 = arith.mulf %87, %88 : vector<16x1024xf32>
    %90 = arith.addf %84, %89 : vector<16x1024xf32>
    %91 = arith.mulf %29, %90 : vector<16x1024xf32>
    %cst_20 = arith.constant dense<0.000000e+00> : vector<1024xf32>
    %92 = vector.multi_reduction <add>, %91, %cst_20 [0] : vector<16x1024xf32> to vector<1024xf32>
    %93 = vector.shape_cast %92 : vector<1024xf32> to vector<1x1024xf32>
    %94 = arith.addf %93, %36 : vector<1x1024xf32>
    %c0_21 = arith.constant 0 : index
    %c0_22 = arith.constant 0 : index
    %95 = vector.load %arg9[%c0_21, %c0_22] : memref<1x1024xf32, #tpu.memory_space<vmem>>, vector<1x1024xf32>
    tpu.vector_store %arg9[%c0_21, %c0_22], %94 {strides = array<i32>} : memref<1x1024xf32, #tpu.memory_space<vmem>>, vector<1x1024xf32>,
    return
  }
  func.func @transform_0(%arg0: i32) -> (i32, i32) {
    %c0_i32 = arith.constant 0 : i32
    %c0_i32_0 = arith.constant 0 : i32
    return %c0_i32, %arg0 : i32, i32
  }
  func.func @transform_1(%arg0: i32) -> (i32, i32) {
    %c0_i32 = arith.constant 0 : i32
    %c0_i32_0 = arith.constant 0 : i32
    return %c0_i32, %arg0 : i32, i32
  }
  func.func @transform_2(%arg0: i32) -> (i32, i32) {
    %c0_i32 = arith.constant 0 : i32
    %c0_i32_0 = arith.constant 0 : i32
    return %c0_i32, %arg0 : i32, i32
  }
  func.func @transform_3(%arg0: i32) -> (i32, i32) {
    %c0_i32 = arith.constant 0 : i32
    %c0_i32_0 = arith.constant 0 : i32
    %c0_i32_1 = arith.constant 0 : i32
    return %c0_i32, %c0_i32_0 : i32, i32
  }
  func.func @transform_4(%arg0: i32) -> (i32, i32) {
    %c0_i32 = arith.constant 0 : i32
    %c0_i32_0 = arith.constant 0 : i32
    %c0_i32_1 = arith.constant 0 : i32
    return %c0_i32, %c0_i32_0 : i32, i32
  }
  func.func @transform_5(%arg0: i32) -> (i32, i32) {
    %c0_i32 = arith.constant 0 : i32
    %c0_i32_0 = arith.constant 0 : i32
    %c0_i32_1 = arith.constant 0 : i32
    return %c0_i32, %c0_i32_0 : i32, i32
  }
  func.func @transform_6(%arg0: i32) -> (i32, i32) {
    %c0_i32 = arith.constant 0 : i32
    %c0_i32_0 = arith.constant 0 : i32
    %c0_i32_1 = arith.constant 0 : i32
    return %c0_i32, %c0_i32_0 : i32, i32
  }
  func.func @transform_7(%arg0: i32) -> (i32, i32) {
    %c0_i32 = arith.constant 0 : i32
    %c0_i32_0 = arith.constant 0 : i32
    %c0_i32_1 = arith.constant 0 : i32
    return %c0_i32, %c0_i32_0 : i32, i32
  }
  func.func @transform_8(%arg0: i32) -> (i32, i32) {
    %c0_i32 = arith.constant 0 : i32
    %c0_i32_0 = arith.constant 0 : i32
    return %c0_i32, %arg0 : i32, i32
  }
}

</mosaic_0001>

<bundles_post_ra>
// kernel: tpu_custom_call.1
= control target key start
LH: loop header
LB: loop body
LE: loop exit
PB: predicated region body
PF: predicated region fallthrough
CT: control target
= control target key end

     0   :  { %13 = vsyncpa [#allocation3], 0  ;;  %s4168_s0 = inlined_call_operand.hbm [shape: f32[4,4096], index: 0, kind: input, shape index: {}]   ;;  %s4169_s1 = inlined_call_operand.vmem [shape: s32[1,4096], index: 1, kind: input, shape index: {}]   ;;  %s4170_s2 = inlined_call_operand.vmem [shape: s32[1,4096], index: 2, kind: input, shape index: {}]   ;;  %s4171_s3 = inlined_call_operand.vmem [shape: f32[4,1], index: 3, kind: input, shape index: {}]   ;;  %s4172_s4 = inlined_call_operand.vmem [shape: f32[16,8], index: 4, kind: input, shape index: {}]   ;;  %s4173_s5 = inlined_call_operand.vmem [shape: f32[16,8], index: 5, kind: input, shape index: {}]   ;;  %s4174_s6 = inlined_call_operand.vmem [shape: f32[8,1], index: 6, kind: input, shape index: {}]   ;;  %s4175_s7 = inlined_call_operand.vmem [shape: f32[16,8], index: 7, kind: input, shape index: {}]   ;;  %s4176_s8 = inlined_call_operand.hbm [shape: f32[1,4096], index: 8, kind: output, shape index: {}]  }
   0x1   :  { %15 = vsyncpa [#allocation3 + $0x1], 0 }
   0x2   :  { %16 = vsyncpa [#allocation4], 0 }
   0x3   :  { %18 = vsyncpa [#allocation4 + $0x1], 0  ;;  %s2824_s27 = smov 0   ;;  %s2826_s28 = smov 0  }
   0x4   :  { %s2828_s29 = smov 0   ;;  %s2830_s30 = smov 0  }
   0x5 LB: > { %s2845_s9 = sadd.s32 4294967295, %s2764_s30   ;;  %s2498_s10 = sadd.s32 4294967294, %s2764_s30   ;;  %s2764_s30 = sphi %s2830_s30, %s4422_s30   ;;  %s2760_s29 = sphi %s2828_s29, %s4421_s29   ;;  %s2756_s28 = sphi %s2826_s28, %s4420_s28   ;;  %s2752_s27 = sphi %s2824_s27, %s4419_s27  }
   0x6   : > { %s2849_s11 = sadd.s32 1, %s2764_s30   ;;  %s31_s12 = sadd.s32 1, %s2760_s29 }
   0x7   : > { %s28_s13 = ssub.s32 %s2764_s30, %s2849_s11  ;;  %p38_p0 = scmp.ne.s32.totalorder %s2760_s29, %s2756_s28 }
   0x8   : > { %p29_p1 = scmp.eq.s32.totalorder %s28_s13, 0  ;;  %p39_p2 = scmp.eq.s32.totalorder %s2764_s30, 0 }
   0x9   : > { %p44_p3 = scmp.ne.s32.totalorder %s2756_s28, %s2752_s27  ;;  %p45_p4 = scmp.eq.s32.totalorder %s2845_s9, 0 }
   0xa   : > { %s2861_s14 = scalar_select %p29_p1, %s2760_s29, %s31_s12  }
   0xb   : > { %p2863_p5 = por %p39_p2, %p38_p0  ;;  %p2867_p6 = por %p45_p4, %p44_p3 }
   0xc   : > { %p225_p7 = scmp.eq.s32.totalorder %s2845_s9, 3  ;;  %p231_p8 = scmp.eq.s32.totalorder %s2498_s10, 3 }
   0xd   : > { %p2608_p9 = scmp.lt.s32.totalorder %s2764_s30, 4  ;;  %s266_s19 = sand.u32 1, %s2760_s29  }
   0xe   : > { %p2873_p10 = por %p225_p7, %p38_p0  ;;  %p2877_p11 = por %p231_p8, %p44_p3 }
   0xf   : > { %s2562_s20 = sshll.u32 %s2764_s30, 9  ;;  %s2501_s21 = sshll.u32 %s266_s19, 5 }
  0x10   : > { %s4188_s17 = scalar_select %p2873_p10, 1, 0 }
  0x11   : > { %s4189_s18 = scalar_select %p2877_p11, 1, 0 }
  0x12   : > { %s2886_s24 = scalar_lea.hbm %s4168_s0, %s2562_s20  ;;  %s270_s25 = scalar_lea.vmem [#allocation2], %s2501_s21 }
  0x13   : > { %s278_s26 = sshll.u32 %s270_s25, 4  ;;  %p2890_p12 = pnand %p2608_p9, %p2863_p5  ;;  %s2894_s26 = int_to_ptr.vmem [resolvable:$true] %s278_s26 }
  0x14   : > { %s267_s12 = scalar_lea.sflag [#allocation3], %s266_s19  ;;  %s2668_s13 = scalar_lea.hbm %s2886_s24, 512 }
  0x15   : > { %p2669_p1 = scmp.ne.s32.totalorder %s2886_s24, %s2668_s13  ;;  %p2670_p2 = pneg %p2890_p12 }
  0x16   : > { %s2673_s21 = scalar_lea.hbm %s4168_s0, 2048  ;;  %p2674_p5 = scmp.lt.u32.totalorder %s2886_s24, %s4168_s0 }
  0x17   : > { %p2671_p3 = pnand %p2670_p2, %p2669_p1  ;;  %p2675_p7 = scmp.lt.u32.totalorder %s2673_s21, %s2668_s13 }
  0x18   : > { %p2677_p9 = scmp.lt.u32.totalorder %s2668_s13, %s2886_s24 }
  0x19   : > { %p2672_p4 = pneg %p2671_p3  ;;  %p2676_p8 = por %p2675_p7, %p2674_p5 }
  0x1b   : > { %p2678_p13 = por %p2677_p9, %p2676_p8 }
  0x1d   : > { %p2679_p0 = pnand %p2678_p13, %p2672_p4 }
  0x1f   : > { %2682 = shalt.err (!%p2679_p0)
}
  0x20   : > { %s2683_s19 = scalar_lea.vmem %s2894_s26, 512  ;;  %s2766_s25 = smov [#allocation2]  }
  0x21   : > { %p2684_p1 = scmp.ne.s32.totalorder %s2894_s26, %s2683_s19  ;;  %s2688_s15 = sshll.u32 %s2766_s25, 4  ;;  %s2689_s15 = int_to_ptr.vmem [resolvable:$false] %s2688_s15 }
  0x22   : > { %s2690_s20 = scalar_lea.vmem %s2689_s15, 1024  ;;  %p2691_p10 = scmp.lt.s32.totalorder %s2894_s26, %s2689_s15 }
  0x23   : > { %p2686_p3 = pnand %p2684_p1, %p2670_p2  ;;  %p2692_p5 = scmp.lt.s32.totalorder %s2690_s20, %s2683_s19 }
  0x25   : > { %p2687_p11 = pneg %p2686_p3  ;;  %p2693_p7 = por %p2692_p5, %p2691_p10 }
  0x27   : > { %p2694_p8 = pnand %p2693_p7, %p2687_p11 }
  0x29   : > { %2697 = shalt.err (!%p2694_p8)
}
  0x2a   : > { %2603 = dma.hbm_to_vmem [thread:$0]  (!%p2890_p12), %s2886_s24, 512, %s2894_s26, %s267_s12  }
  0x2b   : > { %p4191_p13 = scmp.lt.s32.totalorder %s2764_s30, 5  ;;  %p4192_p0 = scmp.ge.s32.totalorder %s2764_s30, 1 }
  0x2d   : > { %p300_p2 = pnand %p4192_p0, %p4191_p13 }
  0x2f   : > { %303 = sbr.rel (%p300_p2) target bundleno = 390 (0x186), region = 52 }
  0x36   : > { %s2928_s13 = sand.u32 1, %s2756_s28  }
  0x37   : > { %s2505_s21 = sshll.u32 %s2928_s13, 5  ;;  %s306_s22 = scalar_lea.sflag [#allocation3], %s2928_s13 }
  0x38   : > { %s2932_s23 = scalar_lea.vmem [#allocation2], %s2505_s21 }
  0x39   : > { %2743 = dma.done.wait (%p2867_p6), %s306_s22, 512  }
  0x3a   : > { %2745 = vsyncadd (%p2867_p6), %s306_s22, 4294966784  ;;  %s2507_s24 = sshll.u32 %s2845_s9, 3  ;;  %v365_v0 = vlaneseq  ;;  %v2767_v1 = vmov 0   ;;  %vm443_vm0 = vcmask 1043456   ;;  %v431_v11 = vld [vmem:[%s4172_s4] sm:$0xff]  ;;  %v432_v12 = vld [vmem:[%s4172_s4 + $0x8] sm:$0xff] }
  0x3b   : > { %p352_p10 = scmp.lt.s32.totalorder %s2507_s24, 31  ;;  %500 = vmatprep.mubr.bf16.mxu0 %v2767_v1  ;;  %543 = vmatprep.mubr.bf16.mxu1 %v2767_v1  ;;  %v2985_v18 = vpack.c.bf16 %v432_v12, %v431_v11  ;;  %v2993_v22 = vld [vmem:[%s4175_s7 + $0x8] sm:$0xff]  ;;  %v1327_v23 = vld [vmem:[%s4171_s3] sm:$0xf]  ;;  %v2768_v24 = vmov 0.0   ;;  %vm439_vm7 = vcmask 64512  }
  0x3c   : > { %v2941_v2 = vshrl.u32 %v365_v0, 7  ;;  %2654 = vset.pattern.permute.xlu1 %v2767_v1  ;;  %2653 = vset.pattern.permute.xlu0 %v2767_v1  ;;  %v3020_v39 = vld [vmem:[%s4175_s7] sm:$0xff]  ;;  %v2769_v45 = vmov 1   ;;  %v2770_v53 = vmov 2   ;;  %s2563_s26 = sshll.u32 %s2845_s9, 7  ;;  %s2396_s15 = scalar_lea.sflag [#allocation4], %s2928_s13 }
  0x3d   : > { %s4424_s24 = smov (!%p352_p10, %s2507_s24), 31  ;;  %1353 = vperm.xlu1 %2654, %v2993_v22   ;;  %1330 = vperm.xlu0 %2653, %v1327_v23   ;;  %v434_v33 = vunpack.c.l.bf16 %v2985_v18  ;;  %v435_v34 = vunpack.c.h.bf16 %v2985_v18  ;;  %p4417_p11 = scmp.ne.s32.totalorder %s4188_s17, 0 }
  0x3e   : > { %4193 = vst [vmem:[#allocation8_spill] sm:$0xff] %v2941_v2  ;;  %v2948_v3 = vsub.s32 1, %v2941_v2  ;;  %v2951_v4 = vsub.s32 3, %v2941_v2  ;;  %v2954_v5 = vsub.s32 0, %v2941_v2  ;;  %v2957_v6 = vsub.s32 2, %v2941_v2  ;;  %s354_s10 = scalar_lea.vmem %s4169_s1, %s4424_s24  ;;  %s359_s25 = scalar_lea.vmem %s4170_s2, %s4424_s24 }
  0x3f   : > { %v2964_v7 = vsub.s32 5, %v2941_v2  ;;  %v2967_v8 = vsub.s32 7, %v2941_v2  ;;  %v2970_v9 = vsub.s32 4, %v2941_v2  ;;  %v363_v10 = vld [vmem:[%s354_s10] sm:$0xff]  ;;  %v2979_v13 = vsub.s32 6, %v2941_v2  ;;  %s4125_s24 = scalar_lea.hbm %s4176_s8, %s2563_s26  ;;  %s2778_s20 = smov [#allocation5]  }
  0x40   : > { %v374_v14 = vrot.slane %v363_v10, %v2948_v3  ;;  %v382_v15 = vrot.slane %v363_v10, %v2951_v4  ;;  %v370_v16 = vrot.slane %v363_v10, %v2954_v5  ;;  %v378_v17 = vrot.slane %v363_v10, %v2957_v6  ;;  %v3039_v52 = vld [vmem:[%s359_s25] sm:$0xff]  ;;  %s2702_s21 = sshll.u32 %s2778_s20, 4  ;;  %s2703_s21 = int_to_ptr.vmem [resolvable:$false] %s2702_s21 }
  0x41   : > { %v390_v19 = vrot.slane %v363_v10, %v2964_v7  ;;  %v398_v20 = vrot.slane %v363_v10, %v2967_v8  ;;  %v386_v21 = vrot.slane %v363_v10, %v2970_v9  ;;  %v436_v40 = vsub.f32 %v431_v11, %v434_v33  ;;  %2655 = vset.pattern.permute.xlu1 %v2769_v45  ;;  %v880_v11 = vld [vmem:[%s4173_s5 + $0x8] sm:$0xff]  ;;  %s2704_s22 = scalar_lea.vmem %s2703_s21, 256 }
  0x42   : > { %vm400_vm1 = vcmp.eq.s32.totalorder %v2941_v2, %v374_v14  ;;  %vm402_vm2 = vcmp.eq.s32.totalorder %v2941_v2, %v382_v15  ;;  %vm399_vm3 = vcmp.eq.s32.totalorder %v2941_v2, %v370_v16  ;;  %vm401_vm4 = vcmp.eq.s32.totalorder %v2941_v2, %v378_v17  ;;  %1465 = vperm.xlu1 %2655, %v3020_v39  }
  0x43   : > { %v2510_v25 = vsel %vm400_vm1, 1.0, %v2768_v24  ;;  %v2512_v26 = vsel %vm402_vm2, 1.0, %v2768_v24  ;;  %v2509_v27 = vsel %vm399_vm3, 1.0, %v2768_v24  ;;  %v2511_v28 = vsel %vm401_vm4, 1.0, %v2768_v24  ;;  %1348 = vperm.xlu0 %2653, %v3020_v39  }
  0x44   : > { %v424_v29 = vpack.c.bf16 %v2510_v25, %v2510_v25  ;;  %v426_v30 = vpack.c.bf16 %v2512_v26, %v2512_v26  ;;  %v423_v31 = vpack.c.bf16 %v2509_v27, %v2509_v27  ;;  %v425_v32 = vpack.c.bf16 %v2511_v28, %v2511_v28 }
  0x45   : > { %vm404_vm5 = vcmp.eq.s32.totalorder %v2941_v2, %v390_v19  ;;  %vm406_vm6 = vcmp.eq.s32.totalorder %v2941_v2, %v398_v20  ;;  %v437_v41 = vsub.f32 %v432_v12, %v435_v34  ;;  %vm403_vm8 = vcmp.eq.s32.totalorder %v2941_v2, %v386_v21 }
  0x46   : > { %2517 = vmatprep.subr.msk.bf16.mxu0 %vm443_vm0, %v424_v29  ;;  %2519 = vmatprep.subr.msk.bf16.mxu1 %vm443_vm0, %v426_v30  ;;  %v445_v35 = vsel %vm443_vm0, %v423_v31, 0  ;;  %v451_v36 = vsel %vm443_vm0, %v425_v32, 0  ;;  %v2514_v37 = vsel %vm404_vm5, 1.0, %v2768_v24  ;;  %v2516_v38 = vsel %vm406_vm6, 1.0, %v2768_v24 }
  0x47   : > { %469 = vmatpush1.bf16.msra.mxu0 %v445_v35  ;;  %512 = vmatpush1.bf16.msra.mxu1 %v451_v36  ;;  %v428_v42 = vpack.c.bf16 %v2514_v37, %v2514_v37  ;;  %v430_v43 = vpack.c.bf16 %v2516_v38, %v2516_v38  ;;  %v394_v44 = vrot.slane %v363_v10, %v2979_v13  ;;  %v2513_v47 = vsel %vm403_vm8, 1.0, %v2768_v24  ;;  %v879_v10 = vld [vmem:[%s4173_s5] sm:$0xff] }
  0x48   : > { %v438_v46 = vpack.c.bf16 %v437_v41, %v436_v40  ;;  %v427_v48 = vpack.c.bf16 %v2513_v47, %v2513_v47  ;;  %2657 = vset.pattern.permute.xlu1 %v2770_v53  ;;  %v822_v55 = vrot.slane %v3039_v52, %v2948_v3  ;;  %v830_v56 = vrot.slane %v3039_v52, %v2951_v4 }
  0x49   : > { %2521 = vmatprep.subr.msk.bf16.mxu0 %vm443_vm0, %v428_v42  ;;  %2523 = vmatprep.subr.msk.bf16.mxu1 %vm443_vm0, %v430_v43  ;;  %vm405_vm9 = vcmp.eq.s32.totalorder %v2941_v2, %v394_v44  ;;  %v818_v58 = vrot.slane %v3039_v52, %v2954_v5  ;;  %v826_v59 = vrot.slane %v3039_v52, %v2957_v6  ;;  %v2771_v12 = vmov 3  }
  0x4a   : > { %2518 = vmatmul.mubr.msk.bf16.vlgmr.msra.gmra.mrb[0].mxu0 %vm439_vm7, %v438_v46  ;;  %2520 = vmatmul.mubr.msk.bf16.vlgmr.msra.gmra.mrb[0].mxu1 %vm439_vm7, %v438_v46  ;;  %v2515_v49 = vsel %vm405_vm9, 1.0, %v2768_v24  ;;  %v457_v50 = vsel %vm443_vm0, %v427_v48, 0  ;;  %vm3054_vm10 = vcmp.eq.s32.totalorder %v2941_v2, %v822_v55  ;;  %vm3063_vm11 = vcmp.eq.s32.totalorder %v2941_v2, %v830_v56 }
  0x4b   : > { %v429_v51 = vpack.c.bf16 %v2515_v49, %v2515_v49  ;;  %586 = vmatprep.mubr.bf16.mxu0 %v2767_v1  ;;  %629 = vmatprep.mubr.bf16.mxu1 %v2767_v1  ;;  %v2534_v61 = vsel %vm3054_vm10, 1.0, %v2768_v24  ;;  %v2536_v62 = vsel %vm3063_vm11, 1.0, %v2768_v24  ;;  %vm3078_vm12 = vcmp.eq.s32.totalorder %v2941_v2, %v818_v58 }
  0x4c   : > { %555 = vmatpush1.bf16.msra.mxu0 %v457_v50  ;;  %1577 = vperm.xlu1 %2657, %v3020_v39   ;;  %vm3083_vm13 = vcmp.eq.s32.totalorder %v2941_v2, %v826_v59  ;;  %v838_v14 = vrot.slane %v3039_v52, %v2964_v7  ;;  %v846_v15 = vrot.slane %v3039_v52, %v2967_v8  ;;  %v2533_v19 = vsel %vm3078_vm12, 1.0, %v2768_v24  ;;  %v1323_v59 = vld [vmem:[%s2932_s23] sm:$0xff] }
  0x4d   : > { %v463_v54 = vsel %vm443_vm0, %v429_v51, 0  ;;  %2525 = vmatprep.subr.msk.bf16.mxu0 %vm443_vm0, %v424_v29  ;;  %2656 = vset.pattern.permute.xlu0 %v2769_v45  ;;  %v872_v16 = vpack.c.bf16 %v2534_v61, %v2534_v61  ;;  %v874_v17 = vpack.c.bf16 %v2536_v62, %v2536_v62  ;;  %v2535_v20 = vsel %vm3083_vm13, 1.0, %v2768_v24  ;;  %v1324_v61 = vld [vmem:[%s2932_s23 + $0x8] sm:$0xff] }
  0x4e   : > { %598 = vmatpush1.bf16.msra.mxu1 %v463_v54  ;;  %1469 = vperm.xlu0 %2656, %v2993_v22   ;;  %v3105_v21 = vpack.c.bf16 %v880_v11, %v879_v10  ;;  %v834_v23 = vrot.slane %v3039_v52, %v2970_v9  ;;  %v842_v25 = vrot.slane %v3039_v52, %v2979_v13  ;;  %v2773_v48 = vmov 5  }
  0x4f   : > { %2527 = vmatprep.subr.msk.bf16.mxu1 %vm443_vm0, %v426_v30  ;;  %vm3116_vm14 = vcmp.eq.s32.totalorder %v2941_v2, %v838_v14  ;;  %vm3121_vm15 = vcmp.eq.s32.totalorder %v2941_v2, %v846_v15  ;;  %v871_v28 = vpack.c.bf16 %v2533_v19, %v2533_v19  ;;  %v873_v29 = vpack.c.bf16 %v2535_v20, %v2535_v20  ;;  %v1325_v20 = vld [vmem:[%s2932_s23 + $0x10] sm:$0xff] }
  0x50   : > { %1581 = vperm.xlu1 %2657, %v2993_v22   ;;  %v882_v30 = vunpack.c.l.bf16 %v3105_v21  ;;  %v883_v31 = vunpack.c.h.bf16 %v3105_v21  ;;  %v2538_v32 = vsel %vm3116_vm14, 1.0, %v2768_v24  ;;  %v2540_v33 = vsel %vm3121_vm15, 1.0, %v2768_v24 }
  0x51   : > { %vm3138_vm1 = vcmp.eq.s32.totalorder %v2941_v2, %v834_v23  ;;  %vm3143_vm2 = vcmp.eq.s32.totalorder %v2941_v2, %v842_v25  ;;  %v891_v37 = vsel %vm443_vm0, %v871_v28, 0  ;;  %v897_v38 = vsel %vm443_vm0, %v873_v29, 0  ;;  %v1326_v28 = vld [vmem:[%s2932_s23 + $0x18] sm:$0xff]  ;;  %s2506_s23 = sshll.u32 %s2928_s13, 3 }
  0x52   : > { %2522 = vmatmul.mubr.msk.bf16.vlgmr.msra.gmra.mrb[4].mxu0 %vm439_vm7, %v438_v46  ;;  %2524 = vmatmul.mubr.msk.bf16.vlgmr.msra.gmra.mrb[4].mxu1 %vm439_vm7, %v438_v46  ;;  %v876_v40 = vpack.c.bf16 %v2538_v32, %v2538_v32  ;;  %v878_v41 = vpack.c.bf16 %v2540_v33, %v2540_v33  ;;  %v884_v44 = vsub.f32 %v879_v10, %v882_v30  ;;  %v2775_v51 = vmov 7   ;;  %s349_s10 = scalar_lea.vmem [#allocation5], %s2506_s23 }
  0x53   : > { %644 = vmatpush1.bf16.msra.mxu0 %v445_v35  ;;  %687 = vmatpush1.bf16.msra.mxu1 %v451_v36  ;;  %v2772_v36 = vmov 4   ;;  %v885_v45 = vsub.f32 %v880_v11, %v883_v31  ;;  %v2776_v52 = vmov 839922192   ;;  %s2410_s12 = sshll.u32 %s349_s10, 4  ;;  %s4127_s12 = int_to_ptr.vmem [resolvable:$true] %s2410_s12 }
  0x54   : > { %675 = vmatprep.mubr.bf16.mxu0 %v2767_v1  ;;  %718 = vmatprep.mubr.bf16.mxu1 %v2767_v1  ;;  %v1333_v53 = vunpack.c.l.s4 %v2776_v52  ;;  %s2698_s9 = scalar_lea.vmem %s4127_s12, 128  ;;  %p2705_p9 = scmp.lt.s32.totalorder %s4127_s12, %s2703_s21 }
  0x55   : > { %2529 = vmatprep.subr.msk.bf16.mxu0 %vm443_vm0, %v428_v42  ;;  %2531 = vmatprep.subr.msk.bf16.mxu1 %vm443_vm0, %v430_v43  ;;  %v2537_v42 = vsel %vm3138_vm1, 1.0, %v2768_v24  ;;  %v2539_v43 = vsel %vm3143_vm2, 1.0, %v2768_v24  ;;  %v886_v24 = vpack.c.bf16 %v885_v45, %v884_v44  ;;  %p2699_p6 = scmp.ne.s32.totalorder %s4127_s12, %s2698_s9  ;;  %p2706_p1 = scmp.lt.s32.totalorder %s2704_s22, %s2698_s9 }
  0x56   : > { %2659 = vset.pattern.permute.xlu1 %v2771_v12  ;;  %2658 = vset.pattern.permute.xlu0 %v2771_v12  ;;  %v875_v46 = vpack.c.bf16 %v2537_v42, %v2537_v42  ;;  %v877_v47 = vpack.c.bf16 %v2539_v43, %v2539_v43 }
  0x57   : > { %1693 = vperm.xlu1 %2659, %v2993_v22   ;;  %1689 = vperm.xlu0 %2658, %v3020_v39   ;;  %p2700_p12 = pnand %p2699_p6, %p4417_p11  ;;  %p2707_p3 = por %p2706_p1, %p2705_p9 }
  0x58   : > { %v909_v49 = vsel %vm443_vm0, %v877_v47, 0 }
  0x59   : > { %p2701_p4 = pneg %p2700_p12 }
  0x5a   : > { %2526 = vmatmul.mubr.msk.bf16.vlgmr.msra.gmra.mrb[0].mxu0 %vm439_vm7, %v2985_v18  ;;  %2528 = vmatmul.mubr.msk.bf16.vlgmr.msra.gmra.mrb[0].mxu1 %vm439_vm7, %v2985_v18 }
  0x5b   : > { %730 = vmatpush1.bf16.msra.mxu0 %v457_v50  ;;  %773 = vmatpush1.bf16.msra.mxu1 %v463_v54  ;;  %v2774_v50 = vmov 6   ;;  %v1334_v54 = vunpack.c.0.s8 %v1333_v53  ;;  %p2708_p5 = pnand %p2707_p3, %p2701_p4 }
  0x5c   : > { %761 = vmatprep.mubr.bf16.mxu0 %v2767_v1  ;;  %804 = vmatprep.mubr.bf16.mxu1 %v2767_v1 }
  0x5d   : > { %2541 = vmatprep.subr.msk.bf16.mxu0 %vm443_vm0, %v872_v16  ;;  %2543 = vmatprep.subr.msk.bf16.mxu1 %vm443_vm0, %v874_v17  ;;  %v1337_v55 = vsub.s32 %v1334_v54, %v2941_v2 }
  0x5e   : > { %2660 = vset.pattern.permute.xlu1 %v2772_v36  ;;  %2661 = vset.pattern.permute.xlu0 %v2772_v36 }
  0x5f   : > { %1805 = vperm.xlu1 %2660, %v3020_v39   ;;  %1809 = vperm.xlu0 %2661, %v2993_v22  }
  0x62   : > { %2530 = vmatmul.mubr.msk.bf16.vlgmr.msra.gmra.mrb[4].mxu0 %vm439_vm7, %v2985_v18  ;;  %2532 = vmatmul.mubr.msk.bf16.vlgmr.msra.gmra.mrb[4].mxu1 %vm439_vm7, %v2985_v18  ;;  %v903_v18 = vsel %vm443_vm0, %v875_v46, 0 }
  0x63   : > { %915 = vmatpush1.bf16.msra.mxu0 %v891_v37  ;;  %958 = vmatpush1.bf16.msra.mxu1 %v897_v38 }
  0x64   : > { %946 = vmatprep.mubr.bf16.mxu0 %v2767_v1  ;;  %989 = vmatprep.mubr.bf16.mxu1 %v2767_v1 }
  0x65   : > { %2545 = vmatprep.subr.msk.bf16.mxu0 %vm443_vm0, %v876_v40  ;;  %2547 = vmatprep.subr.msk.bf16.mxu1 %vm443_vm0, %v878_v41 }
  0x66   : > { %2662 = vset.pattern.permute.xlu1 %v2773_v48  ;;  %2663 = vset.pattern.permute.xlu0 %v2774_v50 }
  0x67   : > { %1921 = vperm.xlu1 %2662, %v3020_v39   ;;  %2033 = vperm.xlu0 %2663, %v3020_v39  }
  0x6a   : > { %2542 = vmatmul.mubr.msk.bf16.vlgmr.msra.gmra.mrb[8].mxu0 %vm439_vm7, %v886_v24  ;;  %2544 = vmatmul.mubr.msk.bf16.vlgmr.msra.gmra.mrb[8].mxu1 %vm439_vm7, %v886_v24 }
  0x6b   : > { %1001 = vmatpush1.bf16.msra.mxu0 %v903_v18  ;;  %1044 = vmatpush1.bf16.msra.mxu1 %v909_v49 }
  0x6c   : > { %1032 = vmatprep.mubr.bf16.mxu0 %v2767_v1  ;;  %1075 = vmatprep.mubr.bf16.mxu1 %v2767_v1 }
  0x6d   : > { %2549 = vmatprep.subr.msk.bf16.mxu0 %vm443_vm0, %v872_v16  ;;  %2551 = vmatprep.subr.msk.bf16.mxu1 %vm443_vm0, %v874_v17 }
  0x6e   : > { %1925 = vperm.xlu1 %2662, %v2993_v22   ;;  %2666 = vset.pattern.permute.xlu0 %v2775_v51 }
  0x6f   : > { %2149 = vperm.xlu0 %2666, %v2993_v22  }
  0x72   : > { %2546 = vmatmul.mubr.msk.bf16.vlgmr.msra.gmra.mrb[12].mxu0 %vm439_vm7, %v886_v24  ;;  %2548 = vmatmul.mubr.msk.bf16.vlgmr.msra.gmra.mrb[12].mxu1 %vm439_vm7, %v886_v24 }
  0x73   : > { %1090 = vmatpush1.bf16.msra.mxu0 %v891_v37  ;;  %1133 = vmatpush1.bf16.msra.mxu1 %v897_v38 }
  0x74   : > { %1121 = vmatprep.mubr.bf16.mxu0 %v2767_v1  ;;  %1164 = vmatprep.mubr.bf16.mxu1 %v2767_v1 }
  0x75   : > { %2553 = vmatprep.subr.msk.bf16.mxu0 %vm443_vm0, %v876_v40  ;;  %2555 = vmatprep.subr.msk.bf16.mxu1 %vm443_vm0, %v878_v41 }
  0x76   : > { %2664 = vset.pattern.permute.xlu1 %v2774_v50 }
  0x77   : > { %2037 = vperm.xlu1 %2664, %v2993_v22   ;;  %v1261_v22 = vld [vmem:[%s4174_s6] sm:$0xff] }
  0x7a   : > { %2550 = vmatmul.mubr.msk.bf16.vlgmr.msra.gmra.mrb[8].mxu0 %vm439_vm7, %v3105_v21  ;;  %2552 = vmatmul.mubr.msk.bf16.vlgmr.msra.gmra.mrb[8].mxu1 %vm439_vm7, %v3105_v21 }
  0x7b   : > { %1176 = vmatpush1.bf16.msra.mxu0 %v903_v18  ;;  %1219 = vmatpush1.bf16.msra.mxu1 %v909_v49 }
  0x7c   : > { %1207 = vmatprep.mubr.bf16.mxu0 %v2767_v1  ;;  %1250 = vmatprep.mubr.bf16.mxu1 %v2767_v1 }
  0x7d   : > { %2665 = vset.pattern.permute.xlu1 %v2775_v51 }
  0x7e   : > { %2145 = vperm.xlu1 %2665, %v3020_v39  }
  0x82   : > { %2554 = vmatmul.mubr.msk.bf16.vlgmr.msra.gmra.mrb[12].mxu0 %vm439_vm7, %v3105_v21  ;;  %2556 = vmatmul.mubr.msk.bf16.vlgmr.msra.gmra.mrb[12].mxu1 %vm439_vm7, %v3105_v21 }
  0x83   : > { %2667 = vset.pattern.permute.xlu1 %v2767_v1 }
  0x84   : > { %1264 = vperm.xlu1 %2667, %v1261_v22  }
  0xbc   : > { %v1331_v39 = vpop.permute.xlu0 %1330  ;;  %v3201_v56 = vpop.permute.xlu1 %1353 }
  0xbd   : > { %v1338_v58 = vrot.slane %v1331_v39, %v1337_v55 }
  0xbf   : > { %v3205_v62 = vsub.f32 %v1323_v59, %v1338_v58  ;;  %v3207_v10 = vsub.f32 %v1324_v61, %v1338_v58  ;;  %v3250_v40 = vsub.f32 %v1325_v20, %v1338_v58  ;;  %v3254_v43 = vsub.f32 %v1326_v28, %v1338_v58 }
  0xc1   : > { %v3209_v11 = vpop.permute.xlu1 %1465  ;;  %v1475_v1 = vrot.slane %v3205_v62, %v2948_v3  ;;  %v1483_v12 = vrot.slane %v3207_v10, %v2948_v3  ;;  %v1363_v14 = vrot.slane %v3205_v62, %v2954_v5  ;;  %v1587_v15 = vrot.slane %v3205_v62, %v2957_v6 }
  0xc2   : > { %v1479_v16 = vrot.slane %v3205_v62, %v2964_v7  ;;  %v1371_v17 = vrot.slane %v3207_v10, %v2954_v5  ;;  %v1595_v19 = vrot.slane %v3207_v10, %v2957_v6  ;;  %v1367_v21 = vrot.slane %v3205_v62, %v2970_v9  ;;  %v3272_v49 = vpop.permute.xlu0 %1348 }
  0xc3   : > { %v1591_v23 = vrot.slane %v3205_v62, %v2979_v13  ;;  %v1487_v25 = vrot.slane %v3207_v10, %v2964_v7  ;;  %v3234_v29 = vrot.slane %v1475_v1, %v2948_v3  ;;  %v3237_v30 = vrot.slane %v1483_v12, %v2948_v3 }
  0xc4   : > { %v1599_v31 = vrot.slane %v3207_v10, %v2979_v13  ;;  %v1403_v33 = vrot.slane %v1363_v14, %v2954_v5  ;;  %v1627_v36 = vrot.slane %v1587_v15, %v2957_v6  ;;  %v3246_v37 = vrot.slane %v1479_v16, %v2948_v3 }
  0xc5   : > { %v1375_v38 = vrot.slane %v3207_v10, %v2970_v9  ;;  %v1411_v41 = vrot.slane %v1371_v17, %v2954_v5  ;;  %v1635_v42 = vrot.slane %v1595_v19, %v2957_v6  ;;  %v1407_v44 = vrot.slane %v1367_v21, %v2954_v5 }
  0xc6   : > { %v1631_v45 = vrot.slane %v1591_v23, %v2957_v6  ;;  %v3259_v46 = vrot.slane %v1487_v25, %v2948_v3  ;;  %v3263_v47 = vmul.f32 %v3234_v29, %v3209_v11  ;;  %v3267_v24 = vmul.f32 %v3237_v30, %v3209_v11 }
  0xc7   : > { %v1639_v48 = vrot.slane %v1599_v31, %v2957_v6  ;;  %v1699_v18 = vrot.slane %v3205_v62, %v2951_v4  ;;  %v3279_v51 = vmul.f32 %v3246_v37, %v3209_v11  ;;  %v1415_v22 = vrot.slane %v1375_v38, %v2954_v5 }
  0xc8   : > { %4210 = vst [vmem:[#allocation9_spill] sm:$0xff] %v3263_v47  ;;  %4211 = vst [vmem:[#allocation10_spill] sm:$0xff] %v3267_v24  ;;  %v3283_v52 = vmul.f32 %v1403_v33, %v3201_v56  ;;  %v3286_v53 = vmul.f32 %v1403_v33, %v3272_v49  ;;  %v3289_v54 = vmul.f32 %v1411_v41, %v3272_v49 }
  0xc9   : > { %4213 = vst [vmem:[#allocation12_spill] sm:$0xff] %v3279_v51  ;;  %v3295_v39 = vmul.f32 %v1411_v41, %v3201_v56  ;;  %v3300_v59 = vmul.f32 %v1407_v44, %v3272_v49  ;;  %v3306_v1 = vmul.f32 %v1415_v22, %v3272_v49  ;;  %v3310_v12 = vmul.f32 %v3259_v46, %v3209_v11 }
  0xca   : > { %v3316_v15 = vrot.slane %v1699_v18, %v2951_v4  ;;  %v1707_v16 = vrot.slane %v3207_v10, %v2951_v4  ;;  %v1379_v17 = vrot.slane %v3250_v40, %v2954_v5  ;;  %v1703_v19 = vrot.slane %v3205_v62, %v2967_v8 }
  0xcb   : > { %v3241_v32 = vpop.permute.xlu1 %1577  ;;  %4216 = vst [vmem:[#allocation15_spill] sm:$0xff] %v3310_v12  ;;  %v1711_v20 = vrot.slane %v3207_v10, %v2967_v8  ;;  %v1491_v21 = vrot.slane %v3250_v40, %v2948_v3  ;;  %v1603_v23 = vrot.slane %v3250_v40, %v2957_v6  ;;  %v3331_v25 = vmul.f32 %v1407_v44, %v3201_v56 }
  0xcc   : > { %v3275_v50 = vmul.f32 %v1627_v36, %v3241_v32  ;;  %v3292_v55 = vmul.f32 %v1635_v42, %v3241_v32  ;;  %v3303_v61 = vmul.f32 %v1631_v45, %v3241_v32  ;;  %v3313_v14 = vmul.f32 %v1639_v48, %v3241_v32 }
  0xcd   : > { %4218 = vst [vmem:[#allocation17_spill] sm:$0xff] %v3331_v25  ;;  %v1715_v28 = vrot.slane %v3250_v40, %v2951_v4  ;;  %v1387_v31 = vrot.slane %v3254_v43, %v2954_v5  ;;  %v1499_v33 = vrot.slane %v3254_v43, %v2948_v3  ;;  %v3346_v18 = vmul.f32 %v1415_v22, %v3201_v56 }
  0xce   : > { %4212 = vst [vmem:[#allocation11_spill] sm:$0xff] %v3275_v50  ;;  %4214 = vst [vmem:[#allocation13_spill] sm:$0xff] %v3292_v55  ;;  %v1611_v44 = vrot.slane %v3254_v43, %v2957_v6  ;;  %v3366_v22 = vrot.slane %v1711_v20, %v2951_v4  ;;  %v3370_v50 = vpop.permute.xlu0 %1469 }
  0xcf   : > { %v3297_v58 = vpop.permute.xlu1 %1581  ;;  %4215 = vst [vmem:[#allocation14_spill] sm:$0xff] %v3303_v61  ;;  %4217 = vst [vmem:[#allocation16_spill] sm:$0xff] %v3313_v14  ;;  %v3351_v14 = vrot.slane %v1707_v16, %v2951_v4  ;;  %v1643_v16 = vrot.slane %v1603_v23, %v2957_v6  ;;  %v1495_v23 = vrot.slane %v3250_v40, %v2964_v7 }
  0xd0   : > { %v3340_v38 = vmul.f32 %v1627_v36, %v3297_v58  ;;  %v3343_v41 = vmul.f32 %v1635_v42, %v3297_v58  ;;  %4221 = vst [vmem:[#allocation20_spill] sm:$0xff] %v3346_v18  ;;  %v3354_v61 = vmul.f32 %v1631_v45, %v3297_v58  ;;  %v3357_v55 = vmul.f32 %v1639_v48, %v3297_v58 }
  0xd1   : > { %v1419_v36 = vrot.slane %v1379_v17, %v2954_v5  ;;  %v3363_v42 = vrot.slane %v1703_v19, %v2951_v4  ;;  %v1755_v48 = vrot.slane %v1715_v28, %v2951_v4  ;;  %v1427_v17 = vrot.slane %v1387_v31, %v2954_v5 }
  0xd2   : > { %4219 = vst [vmem:[#allocation18_spill] sm:$0xff] %v3340_v38  ;;  %4220 = vst [vmem:[#allocation19_spill] sm:$0xff] %v3343_v41  ;;  %v1531_v41 = vrot.slane %v1491_v21, %v2948_v3  ;;  %v3380_v19 = vmul.f32 %v3234_v29, %v3370_v50  ;;  %v1651_v20 = vrot.slane %v1611_v44, %v2957_v6 }
  0xd3   : > { %4222 = vst [vmem:[#allocation21_spill] sm:$0xff] %v3354_v61  ;;  %4223 = vst [vmem:[#allocation22_spill] sm:$0xff] %v3357_v55  ;;  %v3373_v45 = vmul.f32 %v1419_v36, %v3272_v49  ;;  %v1539_v55 = vrot.slane %v1499_v33, %v2948_v3  ;;  %v1723_v21 = vrot.slane %v3254_v43, %v2951_v4 }
  0xd4   : > { %4225 = vst [vmem:[#allocation24_spill] sm:$0xff] %v3380_v19  ;;  %v1607_v28 = vrot.slane %v3250_v40, %v2979_v13  ;;  %v1719_v31 = vrot.slane %v3250_v40, %v2967_v8  ;;  %v1503_v29 = vrot.slane %v3254_v43, %v2964_v7  ;;  %v3399_v33 = vmul.f32 %v3237_v30, %v3370_v50 }
  0xd5   : > { %4224 = vst [vmem:[#allocation23_spill] sm:$0xff] %v3373_v45  ;;  %v1383_v44 = vrot.slane %v3250_v40, %v2970_v9  ;;  %v1615_v45 = vrot.slane %v3254_v43, %v2979_v13  ;;  %v3413_v19 = vmul.f32 %v3246_v37, %v3370_v50  ;;  %v3425_v51 = vmul.f32 %v3259_v46, %v3370_v50 }
  0xd6   : > { %v3360_v38 = vpop.permute.xlu1 %1693  ;;  %4227 = vst [vmem:[#allocation26_spill] sm:$0xff] %v3399_v33  ;;  %v1391_v33 = vrot.slane %v3254_v43, %v2970_v9  ;;  %v1763_v37 = vrot.slane %v1723_v21, %v2951_v4  ;;  %v3434_v24 = vmul.f32 %v1531_v41, %v3209_v11  ;;  %v1759_v47 = vrot.slane %v1719_v31, %v2951_v4  ;;  %v1690_v25 = vpop.permute.xlu0 %1689 }
  0xd7   : > { %v3389_v61 = vmul.f32 %v3316_v15, %v3360_v38  ;;  %v3409_v2 = vmul.f32 %v3351_v14, %v3360_v38  ;;  %4229 = vst [vmem:[#allocation28_spill] sm:$0xff] %v3413_v19  ;;  %v3417_v30 = vmul.f32 %v3363_v42, %v3360_v38  ;;  %4231 = vst [vmem:[#allocation30_spill] sm:$0xff] %v3425_v51 }
  0xd8   : > { %v1535_v19 = vrot.slane %v1495_v23, %v2948_v3  ;;  %4233 = vst [vmem:[#allocation32_spill] sm:$0xff] %v3434_v24  ;;  %v1543_v18 = vrot.slane %v1503_v29, %v2948_v3  ;;  %v3440_v46 = vmul.f32 %v1643_v16, %v3241_v32  ;;  %v1423_v51 = vrot.slane %v1383_v44, %v2954_v5 }
  0xd9   : > { %4226 = vst [vmem:[#allocation25_spill] sm:$0xff] %v3389_v61  ;;  %v1727_v61 = vrot.slane %v3254_v43, %v2967_v8  ;;  %4228 = vst [vmem:[#allocation27_spill] sm:$0xff] %v3409_v2  ;;  %v3429_v2 = vmul.f32 %v3366_v22, %v3360_v38  ;;  %v3446_v23 = vmul.f32 %v1427_v17, %v3272_v49 }
  0xda   : > { %4230 = vst [vmem:[#allocation29_spill] sm:$0xff] %v3417_v30  ;;  %v1647_v30 = vrot.slane %v1607_v28, %v2957_v6  ;;  %4234 = vst [vmem:[#allocation33_spill] sm:$0xff] %v3440_v46  ;;  %v3449_v24 = vmul.f32 %v1539_v55, %v3209_v11  ;;  %v3452_v28 = vmul.f32 %v1651_v20, %v3241_v32 }
  0xdb   : > { %4232 = vst [vmem:[#allocation31_spill] sm:$0xff] %v3429_v2  ;;  %v1655_v2 = vrot.slane %v1615_v45, %v2957_v6  ;;  %v1767_v21 = vrot.slane %v1727_v61, %v2951_v4  ;;  %4235 = vst [vmem:[#allocation34_spill] sm:$0xff] %v3446_v23  ;;  %v1431_v31 = vrot.slane %v1391_v33, %v2954_v5 }
  0xdc   : > { %4236 = vst [vmem:[#allocation35_spill] sm:$0xff] %v3449_v24  ;;  %4237 = vst [vmem:[#allocation36_spill] sm:$0xff] %v3452_v28  ;;  %v3455_v29 = vmul.f32 %v1755_v48, %v1690_v25  ;;  %v3457_v46 = vmul.f32 %v1763_v37, %v1690_v25  ;;  %v3460_v45 = vmul.f32 %v1423_v51, %v3272_v49 }
  0xdd   : > { %v3463_v61 = vmul.f32 %v1535_v19, %v3209_v11  ;;  %v3466_v44 = vmul.f32 %v1647_v30, %v3241_v32  ;;  %v3468_v23 = vmul.f32 %v1759_v47, %v1690_v25  ;;  %v3471_v24 = vmul.f32 %v1431_v31, %v3272_v49 }
  0xde   : > { %v3421_v12 = vpop.permute.xlu1 %1805  ;;  %4238 = vst [vmem:[#allocation37_spill] sm:$0xff] %v3455_v29  ;;  %4239 = vst [vmem:[#allocation38_spill] sm:$0xff] %v3457_v46  ;;  %v3474_v33 = vmul.f32 %v1543_v18, %v3209_v11  ;;  %v3479_v46 = vmul.f32 %v1655_v2, %v3241_v32  ;;  %v3481_v28 = vmul.f32 %v1767_v21, %v1690_v25 }
  0xdf   : > { %4240 = vst [vmem:[#allocation39_spill] sm:$0xff] %v3463_v61  ;;  %4241 = vst [vmem:[#allocation40_spill] sm:$0xff] %v3466_v44  ;;  %v3484_v61 = vmul.f32 %v1419_v36, %v3201_v56  ;;  %v3487_v44 = vmul.f32 %v1531_v41, %v3370_v50  ;;  %v3493_v49 = vmul.f32 %v1755_v48, %v3360_v38 }
  0xe0   : > { %4242 = vst [vmem:[#allocation41_spill] sm:$0xff] %v3468_v23  ;;  %4243 = vst [vmem:[#allocation42_spill] sm:$0xff] %v3474_v33  ;;  %v3490_v23 = vmul.f32 %v1643_v16, %v3297_v58  ;;  %v1800_v11 = vmul.f32 %v3205_v62, %v3205_v62  ;;  %v3499_v32 = vmul.f32 %v3207_v10, %v3207_v10 }
  0xe1   : > { %4244 = vst [vmem:[#allocation43_spill] sm:$0xff] %v3479_v46  ;;  %4245 = vst [vmem:[#allocation44_spill] sm:$0xff] %v3481_v28  ;;  %v3502_v28 = vmul.f32 %v1427_v17, %v3201_v56  ;;  %v3505_v36 = vmul.f32 %v1539_v55, %v3370_v50  ;;  %v3508_v41 = vmul.f32 %v1651_v20, %v3297_v58 }
  0xe2   : > { %4246 = vst [vmem:[#allocation45_spill] sm:$0xff] %v3484_v61  ;;  %4247 = vst [vmem:[#allocation46_spill] sm:$0xff] %v3487_v44  ;;  %v3511_v16 = vmul.f32 %v1763_v37, %v3360_v38  ;;  %v3514_v48 = vmul.f32 %v1423_v51, %v3201_v56  ;;  %v3517_v62 = vmul.f32 %v1535_v19, %v3370_v50 }
  0xe3   : > { %4248 = vst [vmem:[#allocation47_spill] sm:$0xff] %v3490_v23  ;;  %4249 = vst [vmem:[#allocation48_spill] sm:$0xff] %v3493_v49  ;;  %v3520_v10 = vmul.f32 %v1647_v30, %v3297_v58  ;;  %v3523_v17 = vmul.f32 %v1759_v47, %v3360_v38  ;;  %v3526_v55 = vmul.f32 %v1431_v31, %v3201_v56 }
  0xe4   : > { %4250 = vst [vmem:[#allocation49_spill] sm:$0xff] %v3502_v28  ;;  %4251 = vst [vmem:[#allocation50_spill] sm:$0xff] %v3505_v36  ;;  %v3529_v20 = vmul.f32 %v1543_v18, %v3370_v50  ;;  %v3532_v37 = vmul.f32 %v1655_v2, %v3297_v58  ;;  %v3535_v51 = vmul.f32 %v1767_v21, %v3360_v38  ;;  %v3546_v50 = vpop.permute.xlu0 %1809 }
  0xe5   : > { %4252 = vst [vmem:[#allocation51_spill] sm:$0xff] %v3508_v41  ;;  %4253 = vst [vmem:[#allocation52_spill] sm:$0xff] %v3511_v16  ;;  %v3538_v19 = vmul.f32 %v3316_v15, %v1690_v25  ;;  %v1819_v30 = vrot.slane %v1800_v11, %v2954_v5  ;;  %v1931_v47 = vrot.slane %v1800_v11, %v2948_v3 }
  0xe6   : > { %v3476_v29 = vpop.permute.xlu1 %1921  ;;  %4254 = vst [vmem:[#allocation53_spill] sm:$0xff] %v3514_v48  ;;  %4255 = vst [vmem:[#allocation54_spill] sm:$0xff] %v3517_v62  ;;  %v1827_v56 = vrot.slane %v3499_v32, %v2954_v5  ;;  %v3549_v2 = vmul.f32 %v3351_v14, %v1690_v25  ;;  %v1939_v58 = vrot.slane %v3499_v32, %v2948_v3 }
  0xe7   : > { %4256 = vst [vmem:[#allocation55_spill] sm:$0xff] %v3520_v10  ;;  %4257 = vst [vmem:[#allocation56_spill] sm:$0xff] %v3523_v17  ;;  %v3554_v15 = vmul.f32 %v3363_v42, %v1690_v25  ;;  %v3557_v38 = vmul.f32 %v3366_v22, %v1690_v25  ;;  %v2043_v18 = vrot.slane %v1800_v11, %v2957_v6 }
  0xe8   : > { %4258 = vst [vmem:[#allocation57_spill] sm:$0xff] %v3526_v55  ;;  %4259 = vst [vmem:[#allocation58_spill] sm:$0xff] %v3529_v20  ;;  %v2051_v21 = vrot.slane %v3499_v32, %v2957_v6  ;;  %v3565_v14 = vmul.f32 %v3250_v40, %v3250_v40  ;;  %v2155_v17 = vrot.slane %v1800_v11, %v2951_v4 }
  0xe9   : > { %4260 = vst [vmem:[#allocation59_spill] sm:$0xff] %v3532_v37  ;;  %4261 = vst [vmem:[#allocation60_spill] sm:$0xff] %v3535_v51  ;;  %v1823_v51 = vrot.slane %v1800_v11, %v2970_v9  ;;  %v2163_v42 = vrot.slane %v3499_v32, %v2951_v4  ;;  %v1935_v16 = vrot.slane %v1800_v11, %v2964_v7 }
  0xea   : > { %4262 = vst [vmem:[#allocation61_spill] sm:$0xff] %v3538_v19  ;;  %4263 = vst [vmem:[#allocation62_spill] sm:$0xff] %v3549_v2  ;;  %v2047_v25 = vrot.slane %v1800_v11, %v2979_v13  ;;  %v1859_v22 = vrot.slane %v1819_v30, %v2954_v5  ;;  %v1971_v49 = vrot.slane %v1931_v47, %v2948_v3 }
  0xeb   : > { %4264 = vst [vmem:[#allocation63_spill] sm:$0xff] %v3554_v15  ;;  %4265 = vst [vmem:[#allocation64_spill] sm:$0xff] %v3557_v38  ;;  %v1867_v37 = vrot.slane %v1827_v56, %v2954_v5  ;;  %v3577_v10 = vmul.f32 %v3254_v43, %v3254_v43  ;;  %v1979_v40 = vrot.slane %v1939_v58, %v2948_v3  ;;  %v3592_v58 = vpop.permute.xlu0 %2033 }
  0xec   : > { %v2159_v41 = vrot.slane %v1800_v11, %v2967_v8  ;;  %v1831_v23 = vrot.slane %v3499_v32, %v2970_v9  ;;  %v1943_v46 = vrot.slane %v3499_v32, %v2964_v7  ;;  %v2083_v30 = vrot.slane %v2043_v18, %v2957_v6 }
  0xed   : > { %v3544_v31 = vpop.permute.xlu1 %1925  ;;  %v2091_v47 = vrot.slane %v2051_v21, %v2957_v6  ;;  %v1863_v56 = vrot.slane %v1823_v51, %v2954_v5  ;;  %v2055_v43 = vrot.slane %v3499_v32, %v2979_v13  ;;  %v3595_v11 = vrot.slane %v2155_v17, %v2951_v4 }
  0xee   : > { %v3598_v62 = vrot.slane %v2163_v42, %v2951_v4  ;;  %v1975_v36 = vrot.slane %v1935_v16, %v2948_v3  ;;  %v2087_v18 = vrot.slane %v2047_v25, %v2957_v6  ;;  %v3603_v21 = vmul.f32 %v1859_v22, %v3421_v12 }
  0xef   : > { %v3606_v51 = vmul.f32 %v1971_v49, %v3476_v29  ;;  %v3609_v44 = vmul.f32 %v1867_v37, %v3421_v12  ;;  %v2167_v17 = vrot.slane %v3499_v32, %v2967_v8  ;;  %v3614_v38 = vmul.f32 %v1979_v40, %v3476_v29 }
  0xf0   : > { %4266 = vst [vmem:[#allocation65_spill] sm:$0xff] %v3603_v21  ;;  %v3617_v42 = vrot.slane %v2159_v41, %v2951_v4  ;;  %v1871_v16 = vrot.slane %v1831_v23, %v2954_v5  ;;  %v1983_v25 = vrot.slane %v1943_v46, %v2948_v3  ;;  %v3622_v21 = vmul.f32 %v2083_v30, %v3592_v58 }
  0xf1   : > { %4267 = vst [vmem:[#allocation66_spill] sm:$0xff] %v3606_v51  ;;  %4268 = vst [vmem:[#allocation67_spill] sm:$0xff] %v3609_v44  ;;  %v3625_v51 = vmul.f32 %v2091_v47, %v3592_v58  ;;  %v3628_v44 = vmul.f32 %v1863_v56, %v3421_v12  ;;  %v2095_v32 = vrot.slane %v2055_v43, %v2957_v6 }
  0xf2   : > { %4269 = vst [vmem:[#allocation68_spill] sm:$0xff] %v3614_v38  ;;  %4270 = vst [vmem:[#allocation69_spill] sm:$0xff] %v3622_v21  ;;  %v3632_v38 = vmul.f32 %v1975_v36, %v3476_v29  ;;  %v3635_v41 = vmul.f32 %v2087_v18, %v3592_v58  ;;  %v1835_v46 = vrot.slane %v3565_v14, %v2954_v5 }
  0xf3   : > { %4271 = vst [vmem:[#allocation70_spill] sm:$0xff] %v3625_v51  ;;  %4272 = vst [vmem:[#allocation71_spill] sm:$0xff] %v3628_v44  ;;  %v1947_v23 = vrot.slane %v3565_v14, %v2948_v3  ;;  %v3642_v21 = vrot.slane %v2167_v17, %v2951_v4  ;;  %v3645_v51 = vmul.f32 %v1859_v22, %v3546_v50 }
  0xf4   : > { %4273 = vst [vmem:[#allocation72_spill] sm:$0xff] %v3632_v38  ;;  %4274 = vst [vmem:[#allocation73_spill] sm:$0xff] %v3635_v41  ;;  %v3648_v43 = vmul.f32 %v1971_v49, %v3544_v31  ;;  %v2059_v38 = vrot.slane %v3565_v14, %v2957_v6  ;;  %v3655_v41 = vmul.f32 %v1871_v16, %v3421_v12 }
  0xf5   : > { %4275 = vst [vmem:[#allocation74_spill] sm:$0xff] %v3645_v51  ;;  %v3658_v15 = vmul.f32 %v1983_v25, %v3476_v29  ;;  %v3661_v17 = vmul.f32 %v1867_v37, %v3546_v50  ;;  %v2171_v22 = vrot.slane %v3565_v14, %v2951_v4  ;;  %v3665_v51 = vpop.permute.xlu0 %2149  ;;  %v3668_v49 = vmul.f32 %v2095_v32, %v3592_v58 }
  0xf6   : > { %v3590_v20 = vpop.permute.xlu1 %2037  ;;  %4276 = vst [vmem:[#allocation75_spill] sm:$0xff] %v3648_v43  ;;  %4277 = vst [vmem:[#allocation76_spill] sm:$0xff] %v3655_v41  ;;  %v3671_v43 = vmul.f32 %v1979_v40, %v3544_v31  ;;  %v3674_v33 = vmul.f32 %v1863_v56, %v3546_v50  ;;  %v3677_v41 = vmul.f32 %v1975_v36, %v3544_v31 }
  0xf7   : > { %4278 = vst [vmem:[#allocation77_spill] sm:$0xff] %v3658_v15  ;;  %4279 = vst [vmem:[#allocation78_spill] sm:$0xff] %v3661_v17  ;;  %v3680_v37 = vmul.f32 %v1871_v16, %v3546_v50  ;;  %v3683_v15 = vmul.f32 %v1983_v25, %v3544_v31  ;;  %v3686_v17 = vrot.slane %v1835_v46, %v2954_v5 }
  0xf8   : > { %4280 = vst [vmem:[#allocation79_spill] sm:$0xff] %v3668_v49  ;;  %4281 = vst [vmem:[#allocation80_spill] sm:$0xff] %v3671_v43  ;;  %v3689_v49 = vrot.slane %v1947_v23, %v2948_v3  ;;  %v3692_v40 = vrot.slane %v2059_v38, %v2957_v6  ;;  %v1843_v56 = vrot.slane %v3577_v10, %v2954_v5 }
  0xf9   : > { %4282 = vst [vmem:[#allocation81_spill] sm:$0xff] %v3674_v33  ;;  %4283 = vst [vmem:[#allocation82_spill] sm:$0xff] %v3677_v41  ;;  %v1955_v36 = vrot.slane %v3577_v10, %v2948_v3  ;;  %v2067_v16 = vrot.slane %v3577_v10, %v2957_v6  ;;  %v3701_v25 = vmul.f32 %v2083_v30, %v3590_v20 }
  0xfa   : > { %4284 = vst [vmem:[#allocation83_spill] sm:$0xff] %v3680_v37  ;;  %4285 = vst [vmem:[#allocation84_spill] sm:$0xff] %v3683_v15  ;;  %v3705_v46 = vmul.f32 %v3595_v11, %v3665_v51  ;;  %v3710_v38 = vrot.slane %v2171_v22, %v2951_v4  ;;  %v2179_v15 = vrot.slane %v3577_v10, %v2951_v4 }
  0xfb   : > { %4286 = vst [vmem:[#allocation85_spill] sm:$0xff] %v3701_v25  ;;  %v3715_v41 = vmul.f32 %v2091_v47, %v3590_v20  ;;  %v3719_v43 = vmul.f32 %v3598_v62, %v3665_v51  ;;  %v3722_v30 = vmul.f32 %v2087_v18, %v3590_v20  ;;  %v3729_v22 = vmul.f32 %v2095_v32, %v3590_v20 }
  0xfc   : > { %4287 = vst [vmem:[#allocation86_spill] sm:$0xff] %v3705_v46  ;;  %v3726_v46 = vmul.f32 %v3617_v42, %v3665_v51  ;;  %v3733_v25 = vmul.f32 %v3642_v21, %v3665_v51  ;;  %v3737_v47 = vmul.f32 %v3686_v17, %v3421_v12  ;;  %v3748_v32 = vmul.f32 %v3692_v40, %v3592_v58 }
  0xfd   : > { %v3652_v44 = vpop.permute.xlu1 %2145  ;;  %4288 = vst [vmem:[#allocation87_spill] sm:$0xff] %v3715_v41  ;;  %4289 = vst [vmem:[#allocation88_spill] sm:$0xff] %v3719_v43  ;;  %v3741_v43 = vmul.f32 %v3689_v49, %v3476_v29  ;;  %v3763_v63 = vrot.slane %v2067_v16, %v2957_v6  ;;  %v1951_v57 = vrot.slane %v3565_v14, %v2964_v7 }
  0xfe   : > { %4290 = vst [vmem:[#allocation89_spill] sm:$0xff] %v3722_v30  ;;  %4291 = vst [vmem:[#allocation90_spill] sm:$0xff] %v3726_v46  ;;  %v3751_v46 = vrot.slane %v1843_v56, %v2954_v5  ;;  %v2063_v0 = vrot.slane %v3565_v14, %v2979_v13  ;;  %v2175_v60 = vrot.slane %v3565_v14, %v2967_v8 }
  0xff   : > { %4292 = vst [vmem:[#allocation91_spill] sm:$0xff] %v3729_v22  ;;  %4293 = vst [vmem:[#allocation92_spill] sm:$0xff] %v3733_v25  ;;  %v3754_v25 = vrot.slane %v1955_v36, %v2948_v3  ;;  %v3771_v36 = vrot.slane %v2179_v15, %v2951_v4  ;;  %v3795_v2 = vmul.f32 %v3763_v63, %v3592_v58 }
 0x100   : > { %4294 = vst [vmem:[#allocation93_spill] sm:$0xff] %v3737_v47  ;;  %4295 = vst [vmem:[#allocation94_spill] sm:$0xff] %v3741_v43  ;;  %v3787_v37 = vmul.f32 %v3751_v46, %v3421_v12  ;;  %v3803_v48 = vrot.slane %v1951_v57, %v2948_v3  ;;  %v3823_v57 = vmul.f32 %v3617_v42, %v3652_v44 }
 0x101   : > { %4296 = vst [vmem:[#allocation95_spill] sm:$0xff] %v3748_v32  ;;  %v1839_v32 = vrot.slane %v3565_v14, %v2970_v9  ;;  %v3791_v33 = vmul.f32 %v3754_v25, %v3476_v29  ;;  %4299 = vst [vmem:[#allocation98_spill] sm:$0xff] %v3795_v2  ;;  %v1847_v14 = vrot.slane %v3577_v10, %v2970_v9 }
 0x102   : > { %4297 = vst [vmem:[#allocation96_spill] sm:$0xff] %v3787_v37  ;;  %v3806_v37 = vrot.slane %v2063_v0, %v2957_v6  ;;  %v3813_v2 = vrot.slane %v2175_v60, %v2951_v4  ;;  %v3819_v9 = vmul.f32 %v3598_v62, %v3652_v44  ;;  %v2071_v60 = vrot.slane %v3577_v10, %v2979_v13 }
 0x103   : > { %v3707_v23 = vpop.permute.xlu1 %1264  ;;  %4298 = vst [vmem:[#allocation97_spill] sm:$0xff] %v3791_v33  ;;  %v3798_v35 = vrot.slane %v1839_v32, %v2954_v5  ;;  %v3810_v33 = vmul.f32 %v3595_v11, %v3652_v44  ;;  %v1959_v32 = vrot.slane %v3577_v10, %v2964_v7  ;;  %v3827_v11 = vmul.f32 %v3642_v21, %v3652_v44 }
 0x104   : > { %v1267_v18 = vsel %vm3078_vm12, %v3707_v23, 0.0  ;;  %v1268_v22 = vsel %vm3054_vm10, %v3707_v23, 0.0  ;;  %v1269_v43 = vsel %vm3083_vm13, %v3707_v23, 0.0  ;;  %v1270_v56 = vsel %vm3063_vm11, %v3707_v23, 0.0 }
 0x105   : > { %v1271_v16 = vsel %vm3138_vm1, %v3707_v23, 0.0  ;;  %v1273_v30 = vsel %vm3143_vm2, %v3707_v23, 0.0  ;;  %v1275_v41 = vrot.slane %v1267_v18, 4  ;;  %v1281_v15 = vrot.slane %v1268_v22, 4 }
 0x106   : > { %v1287_v47 = vrot.slane %v1269_v43, 4  ;;  %v1293_v34 = vrot.slane %v1270_v56, 4  ;;  %v1299_v19 = vrot.slane %v1271_v16, 4  ;;  %v1311_v55 = vrot.slane %v1273_v30, 4 }
 0x107   : > { %v1276_v28 = vadd.f32 %v1275_v41, %v1267_v18  ;;  %v1282_v0 = vadd.f32 %v1281_v15, %v1268_v22  ;;  %v3831_v18 = vmul.f32 %v3710_v38, %v3652_v44  ;;  %v3835_v7 = vmul.f32 %v3771_v36, %v3652_v44 }
 0x108   : > { %v1288_v61 = vadd.f32 %v1287_v47, %v1269_v43  ;;  %v1294_v41 = vadd.f32 %v1293_v34, %v1270_v56  ;;  %v1272_v62 = vsel %vm3116_vm14, %v3707_v23, 0.0  ;;  %v3842_v42 = vmul.f32 %v3798_v35, %v3421_v12 }
 0x109   : > { %4300 = vst [vmem:[#allocation99_spill] sm:$0xff] %v3831_v18  ;;  %4301 = vst [vmem:[#allocation100_spill] sm:$0xff] %v3835_v7  ;;  %v1300_v43 = vadd.f32 %v1299_v19, %v1271_v16  ;;  %v1312_v21 = vadd.f32 %v1311_v55, %v1273_v30  ;;  %v1277_v22 = vrot.slane %v1276_v28, 2  ;;  %v3846_v47 = vmul.f32 %v3803_v48, %v3476_v29 }
 0x10a   : > { %v3849_v56 = vrot.slane %v1847_v14, %v2954_v5  ;;  %v1283_v15 = vrot.slane %v1282_v0, 2  ;;  %v1289_v26 = vrot.slane %v1288_v61, 2  ;;  %v3854_v34 = vrot.slane %v1959_v32, %v2948_v3 }
 0x10b   : > { %v2183_v19 = vrot.slane %v3577_v10, %v2967_v8  ;;  %v1295_v55 = vrot.slane %v1294_v41, 2  ;;  %v1305_v30 = vrot.slane %v1272_v62, 4  ;;  %v3860_v16 = vmul.f32 %v3806_v37, %v3592_v58 }
 0x10c   : > { %v3864_v5 = vmul.f32 %v3813_v2, %v3652_v44  ;;  %v1301_v14 = vrot.slane %v1300_v43, 2  ;;  %v3868_v13 = vmul.f32 %v3686_v17, %v3546_v50  ;;  %v3872_v3 = vmul.f32 %v3689_v49, %v3544_v31 }
 0x10d   : > { %4302 = vst [vmem:[#allocation101_spill] sm:$0xff] %v3860_v16  ;;  %v1313_v8 = vrot.slane %v1312_v21, 2  ;;  %v1274_v10 = vsel %vm3121_vm15, %v3707_v23, 0.0  ;;  %v1278_v32 = vadd.f32 %v1277_v22, %v1276_v28  ;;  %v3879_v7 = vmul.f32 %v3849_v56, %v3421_v12 }
 0x10e   : > { %4303 = vst [vmem:[#allocation102_spill] sm:$0xff] %v3864_v5  ;;  %4304 = vst [vmem:[#allocation103_spill] sm:$0xff] %v3872_v3  ;;  %v3882_v5 = vrot.slane %v2071_v60, %v2957_v6  ;;  %v1284_v18 = vadd.f32 %v1283_v15, %v1282_v0  ;;  %v1290_v17 = vadd.f32 %v1289_v26, %v1288_v61  ;;  %v1317_v6 = vrot.slane %v1274_v10, 4 }
 0x10f   : > { %v3886_v16 = vmul.f32 %v3854_v34, %v3476_v29  ;;  %v2223_v49 = vrot.slane %v2183_v19, %v2951_v4  ;;  %v1296_v3 = vadd.f32 %v1295_v55, %v1294_v41  ;;  %v3891_v27 = vmul.f32 %v3692_v40, %v3590_v20 }
 0x110   : > { %v3895_v12 = vmul.f32 %v3710_v38, %v3665_v51  ;;  %v1306_v28 = vadd.f32 %v1305_v30, %v1272_v62  ;;  %v3897_v23 = vadd.f32 %v1301_v14, %v1300_v43  ;;  %v3899_v61 = vadd.f32 %v1313_v8, %v1312_v21 }
 0x111   : > { %v3903_v29 = vmul.f32 %v3751_v46, %v3546_v50  ;;  %v1279_v4 = vrot.slane %v1278_v32, 1  ;;  %v3907_v0 = vmul.f32 %v3882_v5, %v3592_v58  ;;  %v3911_v40 = vmul.f32 %v3754_v25, %v3544_v31 }
 0x112   : > { %4305 = vst [vmem:[#allocation104_spill] sm:$0xff] %v3897_v23  ;;  %4306 = vst [vmem:[#allocation105_spill] sm:$0xff] %v3899_v61  ;;  %v1285_v38 = vrot.slane %v1284_v18, 1  ;;  %v1291_v41 = vrot.slane %v1290_v17, 1  ;;  %v3914_v62 = vmul.f32 %v2223_v49, %v3652_v44  ;;  %v3918_v43 = vmul.f32 %v3763_v63, %v3590_v20 }
 0x113   : > { %v1297_v46 = vrot.slane %v1296_v3, 1  ;;  %v3922_v21 = vmul.f32 %v3771_v36, %v3665_v51  ;;  %v1307_v58 = vrot.slane %v1306_v28, 2  ;;  %v3926_v22 = vmul.f32 %v3798_v35, %v3546_v50 }
 0x114   : > { %v2777_v26 = vmov 1966171168   ;;  %v1318_v63 = vadd.f32 %v1317_v6, %v1274_v10  ;;  %v3932_v8 = vadd.f32 %v1279_v4, %v1278_v32  ;;  %v3936_v35 = vmul.f32 %v3803_v48, %v3544_v31 }
 0x115   : > { %4307 = vst [vmem:[#allocation106_spill] sm:$0xff] %v3922_v21  ;;  %v2349_v19 = vunpack.c.l.s4 %v2777_v26  ;;  %v3940_v26 = vadd.f32 %v1285_v38, %v1284_v18  ;;  %v3942_v10 = vadd.f32 %v1291_v41, %v1290_v17  ;;  %v3946_v4 = vadd.f32 %v1297_v46, %v1296_v3  ;;  %v4312_v18 = vld [vmem:[#allocation9_spill] sm:$0xff]  ;;  %v4313_v17 = vld [vmem:[#allocation10_spill] sm:$0xff]  ;;  %v4314_v3 = vld [vmem:[#allocation12_spill] sm:$0xff] }
 0x116   : > { %v3948_v48 = vadd.f32 %v1307_v58, %v1306_v28  ;;  %v3966_v58 = vmul.f32 %v3849_v56, %v3546_v50 }
 0x117   : > { %4308 = vst [vmem:[#allocation107_spill] sm:$0xff] %v3946_v4  ;;  %v4343_v4 = vld [vmem:[#allocation63_spill] sm:$0xff] }
 0x118   : > { %4309 = vst [vmem:[#allocation108_spill] sm:$0xff] %v3948_v48 }
 0x12d   : > { %v677_v25 = vpop.f32.mrb[0].mxu0  ;;  %v720_v60 = vpop.f32.mrb[0].mxu1 }
 0x12e   : > { %v1448_v55 = vadd.f32 %v3286_v53, %v677_v25  ;;  %v1450_v30 = vadd.f32 %v3289_v54, %v720_v60  ;;  %v679_v36 = vpop.f32.mrb[1].mxu0  ;;  %v722_v14 = vpop.f32.mrb[1].mxu1  ;;  %v4310_v25 = vld [vmem:[#allocation17_spill] sm:$0xff]  ;;  %v4311_v60 = vld [vmem:[#allocation20_spill] sm:$0xff] }
 0x12f   : > { %v1449_v21 = vadd.f32 %v3300_v59, %v679_v36  ;;  %v1451_v15 = vadd.f32 %v3306_v1, %v722_v14  ;;  %v681_v44 = vpop.f32.mrb[2].mxu0  ;;  %v724_v61 = vpop.f32.mrb[2].mxu1  ;;  %v2350_v36 = vunpack.c.0.s8 %v2349_v19  ;;  %v1319_v14 = vrot.slane %v1318_v63, 2  ;;  %v4316_v19 = vld [vmem:[#allocation24_spill] sm:$0xff] }
 0x130   : > { %v1456_v53 = vadd.f32 %v3283_v52, %v681_v44  ;;  %v1458_v54 = vadd.f32 %v3295_v39, %v724_v61  ;;  %v683_v32 = vpop.f32.mrb[3].mxu0  ;;  %v726_v6 = vpop.f32.mrb[3].mxu1  ;;  %v1560_v38 = vadd.f32 %v4312_v18, %v1448_v55  ;;  %v1562_v41 = vadd.f32 %v4313_v17, %v1450_v30  ;;  %v4315_v61 = vld [vmem:[#allocation15_spill] sm:$0xff]  ;;  %v4324_v18 = vld [vmem:[#allocation13_spill] sm:$0xff] }
 0x131   : > { %v1457_v59 = vadd.f32 %v4310_v25, %v683_v32  ;;  %v1459_v1 = vadd.f32 %v4311_v60, %v726_v6  ;;  %v3956_v52 = vmul.f32 %v3806_v37, %v3590_v20  ;;  %v3960_v39 = vmul.f32 %v3813_v2, %v3665_v51  ;;  %v4317_v37 = vld [vmem:[#allocation26_spill] sm:$0xff]  ;;  %v4320_v60 = vld [vmem:[#allocation8_spill] sm:$0xff] }
 0x132   : > { %v1561_v28 = vadd.f32 %v4314_v3, %v1449_v21  ;;  %v1563_v46 = vadd.f32 %v4315_v61, %v1451_v15  ;;  %v3970_v44 = vmul.f32 %v3854_v34, %v3544_v31  ;;  %v1568_v55 = vadd.f32 %v4316_v19, %v1456_v53  ;;  %v4318_v15 = vld [vmem:[#allocation28_spill] sm:$0xff]  ;;  %v4319_v6 = vld [vmem:[#allocation30_spill] sm:$0xff]  ;;  %v4323_v53 = vld [vmem:[#allocation11_spill] sm:$0xff] }
 0x133   : > { %v1570_v30 = vadd.f32 %v4317_v37, %v1458_v54  ;;  %v3976_v2 = vmul.f32 %v3882_v5, %v3590_v20  ;;  %v3979_v21 = vmul.f32 %v2223_v49, %v3665_v51  ;;  %v1569_v32 = vadd.f32 %v4318_v15, %v1457_v59  ;;  %v4325_v20 = vld [vmem:[#allocation23_spill] sm:$0xff]  ;;  %v4326_v3 = vld [vmem:[#allocation34_spill] sm:$0xff] }
 0x134   : > { %v1571_v50 = vadd.f32 %v4319_v6, %v1459_v1  ;;  %v3984_v31 = vsub.s32 %v2350_v36, %v4320_v60  ;;  %v3986_v34 = vadd.f32 %v1319_v14, %v1318_v63  ;;  %v1672_v54 = vadd.f32 %v4323_v53, %v1560_v38  ;;  %v4327_v59 = vld [vmem:[#allocation14_spill] sm:$0xff]  ;;  %v4328_v1 = vld [vmem:[#allocation16_spill] sm:$0xff]  ;;  %v4330_v60 = vld [vmem:[#allocation19_spill] sm:$0xff] }
 0x135   : > { %v763_v56 = vpop.f32.mrb[4].mxu0  ;;  %v806_v25 = vpop.f32.mrb[4].mxu1  ;;  %v1674_v17 = vadd.f32 %v4324_v18, %v1562_v41  ;;  %v1673_v19 = vadd.f32 %v4327_v59, %v1561_v28  ;;  %v1675_v37 = vadd.f32 %v4328_v1, %v1563_v46  ;;  %v4329_v6 = vld [vmem:[#allocation18_spill] sm:$0xff]  ;;  %v1682_v41 = vadd.f32 %v4330_v60, %v1570_v30  ;;  %v4331_v53 = vld [vmem:[#allocation45_spill] sm:$0xff] }
 0x136   : > { %4321 = vst [vmem:[#allocation17_spill] sm:$0xff] %v3984_v31  ;;  %4322 = vst [vmem:[#allocation20_spill] sm:$0xff] %v3986_v34  ;;  %v1452_v5 = vadd.f32 %v4325_v20, %v763_v56  ;;  %v1454_v51 = vadd.f32 %v4326_v3, %v806_v25  ;;  %v765_v49 = vpop.f32.mrb[5].mxu0  ;;  %v808_v61 = vpop.f32.mrb[5].mxu1  ;;  %v1680_v38 = vadd.f32 %v4329_v6, %v1568_v55  ;;  %v4332_v18 = vld [vmem:[#allocation49_spill] sm:$0xff]  ;;  %v4334_v59 = vld [vmem:[#allocation22_spill] sm:$0xff] }
 0x137   : > { %v1453_v15 = vadd.f32 %v3460_v45, %v765_v49  ;;  %v1455_v36 = vadd.f32 %v3471_v24, %v808_v61  ;;  %v767_v63 = vpop.f32.mrb[6].mxu0  ;;  %v810_v14 = vpop.f32.mrb[6].mxu1  ;;  %v4333_v31 = vld [vmem:[#allocation21_spill] sm:$0xff]  ;;  %v1683_v46 = vadd.f32 %v4334_v59, %v1571_v50  ;;  %v4337_v61 = vld [vmem:[#allocation32_spill] sm:$0xff]  ;;  %v4338_v34 = vld [vmem:[#allocation35_spill] sm:$0xff] }
 0x138   : > { %v1460_v56 = vadd.f32 %v4331_v53, %v767_v63  ;;  %v1462_v25 = vadd.f32 %v4332_v18, %v810_v14  ;;  %v769_v20 = vpop.f32.mrb[7].mxu0  ;;  %v812_v3 = vpop.f32.mrb[7].mxu1  ;;  %v1681_v28 = vadd.f32 %v4333_v31, %v1569_v32  ;;  %v4335_v1 = vld [vmem:[#allocation53_spill] sm:$0xff]  ;;  %v1564_v23 = vadd.f32 %v4337_v61, %v1452_v5  ;;  %v4340_v60 = vld [vmem:[#allocation62_spill] sm:$0xff]  ;;  %v4341_v53 = vld [vmem:[#allocation39_spill] sm:$0xff] }
 0x139   : > { %v1461_v45 = vadd.f32 %v4335_v1, %v769_v20  ;;  %v4336_v49 = vld [vmem:[#allocation57_spill] sm:$0xff]  ;;  %v1566_v55 = vadd.f32 %v4338_v34, %v1454_v51  ;;  %v1786_v63 = vadd.f32 %v4340_v60, %v1674_v17  ;;  %v1565_v14 = vadd.f32 %v4341_v53, %v1453_v15  ;;  %v4342_v18 = vld [vmem:[#allocation42_spill] sm:$0xff]  ;;  %v4344_v31 = vld [vmem:[#allocation64_spill] sm:$0xff] }
 0x13a   : > { %v1463_v24 = vadd.f32 %v4336_v49, %v812_v3  ;;  %v4339_v6 = vld [vmem:[#allocation61_spill] sm:$0xff]  ;;  %v1567_v48 = vadd.f32 %v4342_v18, %v1455_v36  ;;  %v1785_v32 = vadd.f32 %v4343_v4, %v1673_v19  ;;  %v1787_v50 = vadd.f32 %v4344_v31, %v1675_v37  ;;  %v4346_v1 = vld [vmem:[#allocation27_spill] sm:$0xff]  ;;  %v4347_v49 = vld [vmem:[#allocation46_spill] sm:$0xff] }
 0x13b   : > { %v1784_v30 = vadd.f32 %v4339_v6, %v1672_v54  ;;  %v4345_v59 = vld [vmem:[#allocation25_spill] sm:$0xff]  ;;  %v1794_v3 = vadd.f32 %v4346_v1, %v1682_v41  ;;  %v1572_v5 = vadd.f32 %v4347_v49, %v1460_v56  ;;  %v4348_v61 = vld [vmem:[#allocation50_spill] sm:$0xff]  ;;  %v4350_v6 = vld [vmem:[#allocation31_spill] sm:$0xff] }
 0x13c   : > { %v1792_v20 = vadd.f32 %v4345_v59, %v1680_v38  ;;  %v1574_v34 = vadd.f32 %v4348_v61, %v1462_v25  ;;  %v4349_v51 = vld [vmem:[#allocation29_spill] sm:$0xff]  ;;  %v1795_v17 = vadd.f32 %v4350_v6, %v1683_v46  ;;  %v4351_v60 = vld [vmem:[#allocation54_spill] sm:$0xff]  ;;  %v4354_v19 = vld [vmem:[#allocation36_spill] sm:$0xff] }
 0x13d   : > { %v1793_v54 = vadd.f32 %v4349_v51, %v1681_v28  ;;  %v1573_v15 = vadd.f32 %v4351_v60, %v1461_v45  ;;  %v4352_v53 = vld [vmem:[#allocation58_spill] sm:$0xff]  ;;  %v4353_v18 = vld [vmem:[#allocation33_spill] sm:$0xff]  ;;  %v1678_v37 = vadd.f32 %v4354_v19, %v1566_v55  ;;  %v4356_v59 = vld [vmem:[#allocation67_spill] sm:$0xff] }
 0x13e   : > { %v1575_v36 = vadd.f32 %v4352_v53, %v1463_v24  ;;  %v1676_v4 = vadd.f32 %v4353_v18, %v1564_v23  ;;  %v4355_v31 = vld [vmem:[#allocation65_spill] sm:$0xff]  ;;  %v1906_v41 = vadd.f32 %v4356_v59, %v1786_v63  ;;  %v4357_v1 = vld [vmem:[#allocation40_spill] sm:$0xff]  ;;  %v4358_v49 = vld [vmem:[#allocation43_spill] sm:$0xff] }
 0x13f   : > { %v1904_v38 = vadd.f32 %v4355_v31, %v1784_v30  ;;  %v1677_v56 = vadd.f32 %v4357_v1, %v1565_v14  ;;  %v1679_v25 = vadd.f32 %v4358_v49, %v1567_v48  ;;  %v4359_v61 = vld [vmem:[#allocation71_spill] sm:$0xff]  ;;  %v4360_v51 = vld [vmem:[#allocation76_spill] sm:$0xff]  ;;  %v4363_v53 = vld [vmem:[#allocation74_spill] sm:$0xff] }
 0x140   : > { %v1905_v28 = vadd.f32 %v4359_v61, %v1785_v32  ;;  %v1907_v46 = vadd.f32 %v4360_v51, %v1787_v50  ;;  %v4361_v6 = vld [vmem:[#allocation47_spill] sm:$0xff]  ;;  %v1912_v23 = vadd.f32 %v4363_v53, %v1792_v20  ;;  %v4364_v18 = vld [vmem:[#allocation78_spill] sm:$0xff]  ;;  %v4367_v59 = vld [vmem:[#allocation81_spill] sm:$0xff] }
 0x141   : > { %v1684_v45 = vadd.f32 %v4361_v6, %v1572_v5  ;;  %v4362_v60 = vld [vmem:[#allocation51_spill] sm:$0xff]  ;;  %v1914_v55 = vadd.f32 %v4364_v18, %v1794_v3  ;;  %v1913_v14 = vadd.f32 %v4367_v59, %v1793_v54  ;;  %v4369_v49 = vld [vmem:[#allocation37_spill] sm:$0xff]  ;;  %v4370_v61 = vld [vmem:[#allocation38_spill] sm:$0xff] }
 0x142   : > { %v1686_v24 = vadd.f32 %v4362_v60, %v1574_v34  ;;  %v4365_v19 = vld [vmem:[#allocation55_spill] sm:$0xff]  ;;  %v1788_v32 = vadd.f32 %v4369_v49, %v1676_v4  ;;  %v1790_v50 = vadd.f32 %v4370_v61, %v1678_v37  ;;  %v4371_v51 = vld [vmem:[#allocation66_spill] sm:$0xff]  ;;  %v4372_v6 = vld [vmem:[#allocation68_spill] sm:$0xff] }
 0x143   : > { %v1685_v30 = vadd.f32 %v4365_v19, %v1573_v15  ;;  %v4366_v31 = vld [vmem:[#allocation59_spill] sm:$0xff]  ;;  %v2016_v5 = vadd.f32 %v4371_v51, %v1904_v38  ;;  %v2018_v34 = vadd.f32 %v4372_v6, %v1906_v41  ;;  %v4373_v60 = vld [vmem:[#allocation41_spill] sm:$0xff]  ;;  %v4374_v53 = vld [vmem:[#allocation44_spill] sm:$0xff] }
 0x144   : > { %v1687_v63 = vadd.f32 %v4366_v31, %v1575_v36  ;;  %v4368_v1 = vld [vmem:[#allocation83_spill] sm:$0xff]  ;;  %v1789_v20 = vadd.f32 %v4373_v60, %v1677_v56  ;;  %v1791_v3 = vadd.f32 %v4374_v53, %v1679_v25  ;;  %v4375_v18 = vld [vmem:[#allocation72_spill] sm:$0xff]  ;;  %v4376_v19 = vld [vmem:[#allocation77_spill] sm:$0xff] }
 0x145   : > { %v1915_v48 = vadd.f32 %v4368_v1, %v1795_v17  ;;  %v2017_v15 = vadd.f32 %v4375_v18, %v1905_v28  ;;  %v2019_v36 = vadd.f32 %v4376_v19, %v1907_v46  ;;  %v4377_v31 = vld [vmem:[#allocation48_spill] sm:$0xff]  ;;  %v4379_v1 = vld [vmem:[#allocation75_spill] sm:$0xff]  ;;  %v4383_v6 = vld [vmem:[#allocation82_spill] sm:$0xff] }
 0x146   : > { %v1796_v54 = vadd.f32 %v4377_v31, %v1684_v45  ;;  %v4378_v59 = vld [vmem:[#allocation52_spill] sm:$0xff]  ;;  %v2024_v4 = vadd.f32 %v4379_v1, %v1912_v23  ;;  %v2025_v56 = vadd.f32 %v4383_v6, %v1913_v14  ;;  %v4385_v53 = vld [vmem:[#allocation69_spill] sm:$0xff]  ;;  %v4386_v18 = vld [vmem:[#allocation70_spill] sm:$0xff] }
 0x147   : > { %v1798_v17 = vadd.f32 %v4378_v59, %v1686_v24  ;;  %v4380_v49 = vld [vmem:[#allocation80_spill] sm:$0xff]  ;;  %v2128_v28 = vadd.f32 %v4385_v53, %v2016_v5  ;;  %v2130_v46 = vadd.f32 %v4386_v18, %v2018_v34  ;;  %v4387_v19 = vld [vmem:[#allocation93_spill] sm:$0xff]  ;;  %v4390_v1 = vld [vmem:[#allocation79_spill] sm:$0xff] }
 0x148   : > { %v2026_v37 = vadd.f32 %v4380_v49, %v1914_v55  ;;  %v4381_v61 = vld [vmem:[#allocation56_spill] sm:$0xff]  ;;  %v1908_v45 = vadd.f32 %v4387_v19, %v1788_v32  ;;  %v4389_v59 = vld [vmem:[#allocation73_spill] sm:$0xff]  ;;  %v2131_v55 = vadd.f32 %v4390_v1, %v2019_v36  ;;  %v1916_v5 = vadd.f32 %v3868_v13, %v1796_v54  ;;  %v4394_v6 = vld [vmem:[#allocation91_spill] sm:$0xff] }
 0x149   : > { %v1797_v38 = vadd.f32 %v4381_v61, %v1685_v30  ;;  %v4382_v51 = vld [vmem:[#allocation60_spill] sm:$0xff]  ;;  %v2129_v23 = vadd.f32 %v4389_v59, %v2017_v15  ;;  %v1909_v30 = vadd.f32 %v3842_v42, %v1789_v20  ;;  %v4391_v49 = vld [vmem:[#allocation85_spill] sm:$0xff]  ;;  %v4392_v61 = vld [vmem:[#allocation87_spill] sm:$0xff]  ;;  %v1918_v34 = vadd.f32 %v3903_v29, %v1798_v17 }
 0x14a   : > { %v1799_v41 = vadd.f32 %v4382_v51, %v1687_v63  ;;  %v4384_v60 = vld [vmem:[#allocation84_spill] sm:$0xff]  ;;  %v1911_v63 = vadd.f32 %v3879_v7, %v1791_v3  ;;  %v2136_v14 = vadd.f32 %v4391_v49, %v2024_v4  ;;  %v4393_v51 = vld [vmem:[#allocation89_spill] sm:$0xff]  ;;  %v2240_v42 = vadd.f32 %v3810_v33, %v2128_v28  ;;  %v4395_v20 = vld [vmem:[#allocation94_spill] sm:$0xff] }
 0x14b   : > { %v2027_v25 = vadd.f32 %v4384_v60, %v1915_v48  ;;  %v4388_v31 = vld [vmem:[#allocation96_spill] sm:$0xff]  ;;  %v2138_v48 = vadd.f32 %v4392_v61, %v2026_v37  ;;  %v2137_v32 = vadd.f32 %v4393_v51, %v2025_v56  ;;  %v1917_v15 = vadd.f32 %v3926_v22, %v1797_v38  ;;  %v4396_v4 = vld [vmem:[#allocation97_spill] sm:$0xff]  ;;  %v4397_v56 = vld [vmem:[#allocation86_spill] sm:$0xff] }
 0x14c   : > { %v1910_v24 = vadd.f32 %v4388_v31, %v1790_v50  ;;  %v1919_v36 = vadd.f32 %v3966_v58, %v1799_v41  ;;  %v2242_v7 = vadd.f32 %v3819_v9, %v2130_v46  ;;  %v2020_v3 = vadd.f32 %v4395_v20, %v1908_v45  ;;  %v4398_v38 = vld [vmem:[#allocation88_spill] sm:$0xff]  ;;  %v4399_v41 = vld [vmem:[#allocation103_spill] sm:$0xff]  ;;  %v4400_v53 = vld [vmem:[#allocation90_spill] sm:$0xff] }
 0x14d   : > { %v2139_v50 = vadd.f32 %v4394_v6, %v2027_v25  ;;  %v2241_v13 = vadd.f32 %v3823_v57, %v2129_v23  ;;  %v2243_v29 = vadd.f32 %v3827_v11, %v2131_v55  ;;  %v2021_v54 = vadd.f32 %v3846_v47, %v1909_v30  ;;  %v1123_v60 = vpop.f32.mrb[8].mxu0  ;;  %v1166_v25 = vpop.f32.mrb[8].mxu1  ;;  %v4401_v18 = vld [vmem:[#allocation92_spill] sm:$0xff]  ;;  %v4402_v31 = vld [vmem:[#allocation95_spill] sm:$0xff]  ;;  %v4403_v59 = vld [vmem:[#allocation98_spill] sm:$0xff] }
 0x14e   : > { %v2022_v37 = vadd.f32 %v4396_v4, %v1910_v24  ;;  %v2023_v17 = vadd.f32 %v3886_v16, %v1911_v63  ;;  %v2248_v22 = vadd.f32 %v4397_v56, %v2136_v14  ;;  %v2250_v58 = vadd.f32 %v4398_v38, %v2138_v48  ;;  %v1125_v19 = vpop.f32.mrb[9].mxu0  ;;  %v1168_v45 = vpop.f32.mrb[9].mxu1  ;;  %v4404_v63 = vld [vmem:[#allocation101_spill] sm:$0xff]  ;;  %v4406_v20 = vld [vmem:[#allocation100_spill] sm:$0xff] }
 0x14f   : > { %v2028_v33 = vadd.f32 %v4399_v41, %v1916_v5  ;;  %v2030_v9 = vadd.f32 %v3911_v40, %v1918_v34  ;;  %v2249_v28 = vadd.f32 %v4400_v53, %v2137_v32  ;;  %v2251_v57 = vadd.f32 %v4401_v18, %v2139_v50  ;;  %v1127_v55 = vpop.f32.mrb[10].mxu0  ;;  %v1170_v30 = vpop.f32.mrb[10].mxu1 }
 0x150   : > { %v2029_v11 = vadd.f32 %v3936_v35, %v1917_v15  ;;  %v2031_v47 = vadd.f32 %v3970_v44, %v1919_v36  ;;  %v2256_v46 = vmul.f32 %v2240_v42, %v1123_v60  ;;  %v2258_v16 = vmul.f32 %v2242_v7, %v1166_v25  ;;  %v1129_v48 = vpop.f32.mrb[11].mxu0  ;;  %v1172_v44 = vpop.f32.mrb[11].mxu1  ;;  %v4405_v42 = vld [vmem:[#allocation99_spill] sm:$0xff] }
 0x151   : > { %v2132_v24 = vadd.f32 %v4402_v31, %v2020_v3  ;;  %v2134_v23 = vadd.f32 %v4403_v59, %v2022_v37  ;;  %v2257_v1 = vmul.f32 %v2241_v13, %v1125_v19  ;;  %v2259_v40 = vmul.f32 %v2243_v29, %v1168_v45  ;;  %v4407_v37 = vld [vmem:[#allocation102_spill] sm:$0xff] }
 0x152   : > { %v2133_v49 = vadd.f32 %v4404_v63, %v2021_v54  ;;  %v2135_v14 = vadd.f32 %v3907_v0, %v2023_v17  ;;  %v2264_v61 = vmul.f32 %v2248_v22, %v1127_v55  ;;  %v2266_v35 = vmul.f32 %v2250_v58, %v1170_v30  ;;  %v4408_v17 = vld [vmem:[#allocation106_spill] sm:$0xff] }
 0x153   : > { %v2140_v5 = vadd.f32 %v3891_v27, %v2028_v33  ;;  %v2142_v34 = vadd.f32 %v3918_v43, %v2030_v9  ;;  %v2265_v51 = vmul.f32 %v2249_v28, %v1129_v48  ;;  %v2267_v32 = vmul.f32 %v2251_v57, %v1172_v44 }
 0x154   : > { %v2141_v6 = vadd.f32 %v3956_v52, %v2029_v11  ;;  %v2143_v50 = vadd.f32 %v3976_v2, %v2031_v47  ;;  %v2272_v15 = vadd.f32 %v2264_v61, %v2256_v46  ;;  %v2286_v36 = vadd.f32 %v2266_v35, %v2258_v16 }
 0x155   : > { %v2244_v7 = vadd.f32 %v4405_v42, %v2132_v24  ;;  %v2246_v0 = vadd.f32 %v4406_v20, %v2134_v23  ;;  %v2279_v3 = vadd.f32 %v2265_v51, %v2257_v1  ;;  %v2293_v4 = vadd.f32 %v2267_v32, %v2259_v40  ;;  %v1209_v22 = vpop.f32.mrb[12].mxu0  ;;  %v1252_v38 = vpop.f32.mrb[12].mxu1 }
 0x156   : > { %v2245_v13 = vadd.f32 %v4407_v37, %v2133_v49  ;;  %v2247_v27 = vadd.f32 %v3914_v62, %v2135_v14  ;;  %v2273_v29 = vrot.slane %v2272_v15, 4  ;;  %v2287_v43 = vrot.slane %v2286_v36, 4  ;;  %v1211_v53 = vpop.f32.mrb[13].mxu0  ;;  %v1254_v62 = vpop.f32.mrb[13].mxu1 }
 0x157   : > { %v2252_v54 = vadd.f32 %v3895_v12, %v2140_v5  ;;  %v2254_v52 = vadd.f32 %v4408_v17, %v2142_v34  ;;  %v2280_v56 = vrot.slane %v2279_v3, 4  ;;  %v2294_v2 = vrot.slane %v2293_v4, 4  ;;  %v1213_v11 = vpop.f32.mrb[14].mxu0  ;;  %v1256_v47 = vpop.f32.mrb[14].mxu1  ;;  %v4409_v17 = vld [vmem:[#allocation107_spill] sm:$0xff] }
 0x158   : > { %v2253_v58 = vadd.f32 %v3960_v39, %v2141_v6  ;;  %v2255_v41 = vadd.f32 %v3979_v21, %v2143_v50  ;;  %v2274_v33 = vadd.f32 %v2273_v29, %v2272_v15  ;;  %v2288_v9 = vadd.f32 %v2287_v43, %v2286_v36  ;;  %v1215_v31 = vpop.f32.mrb[15].mxu0  ;;  %v1258_v39 = vpop.f32.mrb[15].mxu1 }
 0x159   : > { %v2260_v60 = vmul.f32 %v2244_v7, %v1209_v22  ;;  %v2262_v25 = vmul.f32 %v2246_v0, %v1252_v38  ;;  %v2281_v28 = vadd.f32 %v2280_v56, %v2279_v3  ;;  %v2295_v18 = vadd.f32 %v2294_v2, %v2293_v4  ;;  %v4410_v22 = vld [vmem:[#allocation108_spill] sm:$0xff] }
 0x15a   : > { %v2261_v57 = vmul.f32 %v2245_v13, %v1211_v53  ;;  %v2263_v12 = vmul.f32 %v2247_v27, %v1254_v62  ;;  %v2275_v46 = vrot.slane %v2274_v33, 2  ;;  %v2289_v16 = vrot.slane %v2288_v9, 2  ;;  %v4412_v53 = vld [vmem:[#allocation104_spill] sm:$0xff] }
 0x15b   : > { %v2268_v19 = vmul.f32 %v2252_v54, %v1213_v11  ;;  %v2270_v45 = vmul.f32 %v2254_v52, %v1256_v47  ;;  %v2282_v24 = vrot.slane %v2281_v28, 2  ;;  %v2296_v21 = vrot.slane %v2295_v18, 2 }
 0x15c   : > { %v2269_v59 = vmul.f32 %v2253_v58, %v1215_v31  ;;  %v2271_v23 = vmul.f32 %v2255_v41, %v1258_v39  ;;  %v2276_v1 = vadd.f32 %v2275_v46, %v2274_v33  ;;  %v2290_v40 = vadd.f32 %v2289_v16, %v2288_v9  ;;  %v4411_v58 = vld [vmem:[#allocation20_spill] sm:$0xff]  ;;  %v4415_v46 = vld [vmem:[#allocation105_spill] sm:$0xff] }
 0x15d   : > { %v2300_v55 = vadd.f32 %v2268_v19, %v2260_v60  ;;  %v2314_v30 = vadd.f32 %v2270_v45, %v2262_v25  ;;  %v2283_v63 = vadd.f32 %v2282_v24, %v2281_v28  ;;  %v2297_v49 = vadd.f32 %v2296_v21, %v2295_v18 }
 0x15e   : > { %v2307_v14 = vadd.f32 %v2269_v59, %v2261_v57  ;;  %v2321_v61 = vadd.f32 %v2271_v23, %v2263_v12  ;;  %v2277_v35 = vrot.slane %v2276_v1, 1  ;;  %v2291_v48 = vrot.slane %v2290_v40, 1  ;;  %v4414_v57 = vld [vmem:[#allocation17_spill] sm:$0xff] }
 0x15f   : > { %v2301_v44 = vrot.slane %v2300_v55, 4  ;;  %v2315_v5 = vrot.slane %v2314_v30, 4  ;;  %v2284_v34 = vrot.slane %v2283_v63, 1  ;;  %v2298_v51 = vrot.slane %v2297_v49, 1 }
 0x160   : > { %v2308_v32 = vrot.slane %v2307_v14, 4  ;;  %v2322_v6 = vrot.slane %v2321_v61, 4  ;;  %v2278_v50 = vadd.f32 %v2277_v35, %v2276_v1  ;;  %v2292_v15 = vadd.f32 %v2291_v48, %v2290_v40 }
 0x161   : > { %v2302_v36 = vadd.f32 %v2301_v44, %v2300_v55  ;;  %v2316_v42 = vadd.f32 %v2315_v5, %v2314_v30  ;;  %v2285_v7 = vadd.f32 %v2284_v34, %v2283_v63  ;;  %v2299_v20 = vadd.f32 %v2298_v51, %v2297_v49 }
 0x162   : > { %v2309_v0 = vadd.f32 %v2308_v32, %v2307_v14  ;;  %v2323_v3 = vadd.f32 %v2322_v6, %v2321_v61  ;;  %v2328_v13 = vadd.f32 %v2278_v50, %v3932_v8  ;;  %v2330_v27 = vadd.f32 %v2292_v15, %v3942_v10 }
 0x163   : > { %v2303_v4 = vrot.slane %v2302_v36, 2  ;;  %v2317_v37 = vrot.slane %v2316_v42, 2  ;;  %v2329_v54 = vadd.f32 %v2285_v7, %v3940_v26  ;;  %v2331_v52 = vadd.f32 %v2299_v20, %v4409_v17 }
 0x164   : > { %v2310_v29 = vrot.slane %v2309_v0, 2  ;;  %v2324_v43 = vrot.slane %v2323_v3, 2  ;;  %v1309_v38 = vrot.slane %v4410_v22, 1  ;;  %v1321_v41 = vrot.slane %v4411_v58, 1 }
 0x165   : > { %v2304_v56 = vadd.f32 %v2303_v4, %v2302_v36  ;;  %v2318_v2 = vadd.f32 %v2317_v37, %v2316_v42  ;;  %v2344_v60 = vcombine.low %v2328_v13, %v2329_v54  ;;  %v2345_v25 = vcombine.low %v2330_v27, %v2331_v52 }
 0x166   : > { %v2311_v33 = vadd.f32 %v2310_v29, %v2309_v0  ;;  %v2325_v9 = vadd.f32 %v2324_v43, %v2323_v3  ;;  %v4413_v8 = vrot.slane %v4412_v53, 1  ;;  %v4416_v16 = vrot.slane %v4415_v46, 1 }
 0x167   : > { %v2305_v62 = vrot.slane %v2304_v56, 1  ;;  %v2319_v28 = vrot.slane %v2318_v2, 1  ;;  %v2354_v12 = vrot.slane %v2344_v60, %v4414_v57  ;;  %v2361_v11 = vrot.slane %v2345_v25, %v4414_v57 }
 0x168   : > { %v1304_v10 = vadd.f32 %v4413_v8, %v4412_v53  ;;  %v2312_v18 = vrot.slane %v2311_v33, 1  ;;  %v2326_v26 = vrot.slane %v2325_v9, 1  ;;  %v1316_v19 = vadd.f32 %v4416_v16, %v4415_v46 }
 0x169   : > { %v2306_v47 = vadd.f32 %v2305_v62, %v2304_v56  ;;  %v2320_v45 = vadd.f32 %v2319_v28, %v2318_v2  ;;  %v1310_v31 = vadd.f32 %v1309_v38, %v4410_v22  ;;  %v1322_v24 = vadd.f32 %v1321_v41, %v4411_v58 }
 0x16a   : > { %v2313_v39 = vadd.f32 %v2312_v18, %v2311_v33  ;;  %v2327_v21 = vadd.f32 %v2326_v26, %v2325_v9  ;;  %v2376_v59 = vcombine.low %v2354_v12, %v2361_v11 }
 0x16b   : > { %v2332_v23 = vadd.f32 %v2306_v47, %v1304_v10  ;;  %v2334_v1 = vadd.f32 %v2320_v45, %v1316_v19 }
 0x16c   : > { %v2333_v40 = vadd.f32 %v2313_v39, %v1310_v31  ;;  %v2335_v55 = vadd.f32 %v2327_v21, %v1322_v24  ;;  %v2384_v35 = vrot.slane %v2376_v59, %v4414_v57 }
 0x16e   : > { %v2346_v30 = vcombine.low %v2332_v23, %v2333_v40  ;;  %v2347_v63 = vcombine.low %v2334_v1, %v2335_v55 }
 0x170   : > { %v2368_v49 = vrot.slane %v2346_v30, %v4414_v57  ;;  %v2375_v14 = vrot.slane %v2347_v63, %v4414_v57 }
 0x172   : > { %v2377_v61 = vcombine.low %v2368_v49, %v2375_v14 }
 0x174   : > { %v2391_v48 = vrot.slane %v2377_v61, %v4414_v57 }
 0x176   : > { %v2392_v44 = vcombine.low %v2384_v35, %v2391_v48 }
 0x178   : > { %2394 = vst [vmem:[%s349_s10] sm:$0xff] %v2392_v44 }
 0x179   : > { %2711 = shalt.err (!%p2708_p5)
}
 0x17a   : > { %s2712_s13 = scalar_lea.hbm %s4125_s24, 128  ;;  %s2716_s26 = scalar_lea.hbm %s4176_s8, 512 }
 0x17b   : > { %p2713_p7 = scmp.ne.s32.totalorder %s4125_s24, %s2712_s13  ;;  %p2717_p0 = scmp.lt.u32.totalorder %s4125_s24, %s4176_s8 }
 0x17c   : > { %p2718_p2 = scmp.lt.u32.totalorder %s2716_s26, %s2712_s13  ;;  %p2720_p6 = scmp.lt.u32.totalorder %s2712_s13, %s4125_s24 }
 0x17d   : > { %p2714_p8 = pnand %p2713_p7, %p4417_p11 }
 0x17e   : > { %p2719_p10 = por %p2718_p2, %p2717_p0 }
 0x17f   : > { %p2715_p13 = pneg %p2714_p8 }
 0x180   : > { %p2721_p12 = por %p2720_p6, %p2719_p10 }
 0x182   : > { %p2722_p4 = pnand %p2721_p12, %p2715_p13 }
 0x184   : > { %2725 = shalt.err (!%p2722_p4)
}
 0x185   : > { %2598 = dma.vmem_to_hbm [thread:$0]  (%p4417_p11), %s4127_s12, 128, %s4125_s24, %s2396_s15  }
 0x186 PF: > { %p2609_p9 = scmp.ge.s32.totalorder %s2764_s30, 2  ;;  %s2422_s25 = sand.u32 1, %s2752_s27  }
 0x187   : > { %p4418_p1 = scmp.ne.s32.totalorder %s4189_s18, 0  ;;  %s2423_s9 = scalar_lea.sflag [#allocation4], %s2422_s25 }
 0x189   : > { %p2605_p3 = pnand %p2609_p9, %p4418_p1 }
 0x18b   : > { %2747 = dma.done.wait (!%p2605_p3), %s2423_s9, 128  }
 0x18c   : > { %2749 = vsyncadd (!%p2605_p3), %s2423_s9, 4294967168  ;;  %p21_p5 = scmp.ge.s32.totalorder %s2849_s11, 6   ;;  %s4419_s27 = smov %s2756_s28 }
 0x18d   : > { %s4420_s28 = smov %s2760_s29  ;;  %s4421_s29 = smov %s2861_s14 }
 0x18e   : > { %s4422_s30 = smov %s2849_s11  ;;  %23 = sbr.rel (!%p21_p5) target bundleno = 5 (0x5), region = 103 }
 0x195   :  { %2428 = vsyncpa [#allocation3], 1 }
 0x196   :  { %2430 = vsyncpa [#allocation3 + $0x1], 1 }
 0x197   :  { %2431 = vsyncpa [#allocation4], 1 }
 0x198   :  { %2433 = vsyncpa [#allocation4 + $0x1], 1 }

</bundles_post_ra>
